<compile_context>
chip_gen: v7x
topology: tpu7x:2x2x1
jax: 0.10.0
libtpu: 0.0.40
codegen_flags: <defaults>
</compile_context>

<pallas_src>
import jax
import jax.numpy as jnp
from jax import lax
from jax.experimental import pallas as pl
from jax.experimental.pallas import tpu as pltpu
import numpy as np


def lstm1_kernel(x_ref, params_ref, out_ref):
    """Sequential LSTM recurrence + linear head, everything VMEM-resident.

    x_ref:      (T, I)            input sequence (batch of 1 folded away)
    params_ref: (I + 2H + 4, 4H)  packed slab:
                  [0,   I)        W_ih^T   (i/f/o columns pre-scaled by 0.5)
                  [I,   I+H)      W_hh^T   (i/f/o columns pre-scaled by 0.5)
                  I+H             combined bias (pre-scaled the same way)
                  [I+H+1, I+2H+1) W_lin^T zero-padded to 4H lanes
                  I+2H+1          b_lin   zero-padded to 4H lanes
                  I+2H+2          post_scale  (0.5 on i/f/o lanes, 1 on g)
                  I+2H+3          post_offset (0.5 on i/f/o lanes, 0 on g)
    out_ref:    (1, 4H)           last-step prediction in lanes [0, O)
    """
    T, I = x_ref.shape
    H = (params_ref.shape[0] - I - 4) // 2

    # Static slices of the packed parameter slab (no runtime cost).
    wih = params_ref[0:I, :]                              # (I, 4H)
    whh = params_ref[I:I + H, :]                          # (H, 4H)
    bias = params_ref[I + H:I + H + 1, :]                 # (1, 4H)
    wlin = params_ref[I + H + 1:I + 2 * H + 1, :]         # (H, 4H) padded
    blin = params_ref[I + 2 * H + 1:I + 2 * H + 2, :]     # (1, 4H) padded
    post_scale = params_ref[I + 2 * H + 2:I + 2 * H + 3, :]
    post_offset = params_ref[I + 2 * H + 3:I + 2 * H + 4, :]

    # Hoisted input projection + bias: one MXU pass for all T steps; GX stays
    # in vregs (8x128 = one vreg), rows read with static slices below.
    gx = jnp.dot(x_ref[...], wih, preferred_element_type=jnp.float32,
                 precision=lax.Precision.HIGHEST) + bias   # (T, 4H)

    h = jnp.zeros((1, H), jnp.float32)
    c = jnp.zeros((1, H), jnp.float32)

    # Statically unrolled recurrence; only h @ W_hh^T is on the per-step path.
    for t in range(T):
        gates = gx[t:t + 1, :] + jnp.dot(
            h, whh, preferred_element_type=jnp.float32,
            precision=lax.Precision.HIGHEST)               # (1, 4H)

        # Single full-vreg tanh; sigmoid recovered by the hoisted affine masks
        # (weights were pre-scaled by 0.5 on the i/f/o columns).
        t_all = jnp.tanh(gates)
        acts = t_all * post_scale + post_offset            # one VPU FMA
        i_g = acts[:, 0 * H:1 * H]
        f_g = acts[:, 1 * H:2 * H]
        g_g = acts[:, 2 * H:3 * H]
        o_g = acts[:, 3 * H:4 * H]

        c = f_g * c + i_g * g_g
        h = o_g * jnp.tanh(c)

    # Linear head; extra lanes of wlin/blin are zero so lanes [O, 4H) are 0.
    out_ref[...] = jnp.dot(h, wlin, preferred_element_type=jnp.float32,
                           precision=lax.Precision.HIGHEST) + blin


def lstm1_forward(x, w_ih, w_hh, b_ih, b_hh, w_lin, b_lin):
    """x: (T, I) float32 -> (O,) float32, matching LSTM1.forward's return."""
    T, I = x.shape
    fourH = w_ih.shape[0]
    H = fourH // 4
    O = w_lin.shape[0]
    LANES = fourH  # 128 for H=32

    f32 = jnp.float32
    w_ih = jnp.asarray(w_ih, f32)
    w_hh = jnp.asarray(w_hh, f32)
    b = jnp.asarray(b_ih, f32) + jnp.asarray(b_hh, f32)
    w_lin = jnp.asarray(w_lin, f32)
    b_lin = jnp.asarray(b_lin, f32)

    # sigmoid(z) = 0.5*tanh(z/2) + 0.5: pre-scale i/f/o gate rows by 0.5 so one
    # tanh covers all gates; the post affine is folded into two mask rows.
    gate_ids = jnp.arange(fourH) // H                      # 0:i 1:f 2:g 3:o
    is_g = gate_ids == 2
    pre_scale = jnp.where(is_g, 1.0, 0.5).astype(f32)      # (4H,)
    post_scale = jnp.where(is_g, 1.0, 0.5).astype(f32)
    post_offset = jnp.where(is_g, 0.0, 0.5).astype(f32)

    wih_t = (w_ih * pre_scale[:, None]).T                  # (I, 4H)
    whh_t = (w_hh * pre_scale[:, None]).T                  # (H, 4H)
    bias = (b * pre_scale).reshape(1, fourH)               # (1, 4H)

    wlin_pad = jnp.zeros((H, LANES), f32).at[:, :O].set(w_lin.T)
    blin_pad = jnp.zeros((1, LANES), f32).at[0, :O].set(b_lin)

    # Pack everything except x into one slab -> 2 input DMAs total.
    params = jnp.concatenate(
        [wih_t, whh_t, bias, wlin_pad, blin_pad,
         post_scale.reshape(1, LANES), post_offset.reshape(1, LANES)],
        axis=0)                                            # (I + 2H + 4, 4H)

    vmem = pltpu.MemorySpace.VMEM
    out = pl.pallas_call(
        lstm1_kernel,
        out_shape=jax.ShapeDtypeStruct((1, LANES), f32),
        in_specs=[pl.BlockSpec(memory_space=vmem),         # x
                  pl.BlockSpec(memory_space=vmem)],        # packed params
        out_specs=pl.BlockSpec(memory_space=vmem),
    )(x.astype(f32), params)
    return out[0, :O]                                      # (O,)


def _reference_forward(x, w_ih, w_hh, b_ih, b_hh, w_lin, b_lin):
    """Pure-JAX reference of the PyTorch LSTM1.forward semantics."""
    H = w_hh.shape[1]
    h = jnp.zeros((1, H), jnp.float32)
    c = jnp.zeros((1, H), jnp.float32)
    dot = lambda a, b: jnp.dot(a, b, precision=lax.Precision.HIGHEST)
    for t in range(x.shape[0]):
        x_t = x[t:t + 1]                                   # (1, I)
        gates = dot(x_t, w_ih.T) + dot(h, w_hh.T) + b_ih + b_hh
        i_g = jax.nn.sigmoid(gates[:, 0 * H:1 * H])
        f_g = jax.nn.sigmoid(gates[:, 1 * H:2 * H])
        g_g = jnp.tanh(gates[:, 2 * H:3 * H])
        o_g = jax.nn.sigmoid(gates[:, 3 * H:4 * H])
        c = f_g * c + i_g * g_g
        h = o_g * jnp.tanh(c)
    return (dot(h, w_lin.T) + b_lin)[0]


if __name__ == "__main__":
    # Small shapes consistent with the module: seq=8, input_size=8,
    # hidden_layer_size=32, output_size=4.
    T, I, H, O = 8, 8, 32, 4

    key = jax.random.PRNGKey(0)
    ks = jax.random.split(key, 7)
    bound = 1.0 / np.sqrt(H)  # PyTorch default LSTM/Linear init range

    x = jax.random.normal(ks[0], (T, I), jnp.float32)
    w_ih = jax.random.uniform(ks[1], (4 * H, I), jnp.float32, -bound, bound)
    w_hh = jax.random.uniform(ks[2], (4 * H, H), jnp.float32, -bound, bound)
    b_ih = jax.random.uniform(ks[3], (4 * H,), jnp.float32, -bound, bound)
    b_hh = jax.random.uniform(ks[4], (4 * H,), jnp.float32, -bound, bound)
    w_lin = jax.random.uniform(ks[5], (O, H), jnp.float32, -bound, bound)
    b_lin = jax.random.uniform(ks[6], (O,), jnp.float32, -bound, bound)

    out = lstm1_forward(x, w_ih, w_hh, b_ih, b_hh, w_lin, b_lin)
    out = jax.block_until_ready(out)

    ref = _reference_forward(x, w_ih, w_hh, b_ih, b_hh, w_lin, b_lin)
    np.testing.assert_allclose(np.asarray(out), np.asarray(ref),
                               rtol=2e-5, atol=2e-5)
    assert out.shape == (O,)
    print("KERNEL_OK")
</pallas_src>

<mosaic_0001>
module attributes {stable_mosaic.version = 11 : i64} {
  func.func @lstm1_kernel(%arg0: memref<8x8xf32, #tpu.memory_space<vmem>>, %arg1: memref<76x128xf32, #tpu.memory_space<vmem>>, %arg2: memref<1x128xf32, #tpu.memory_space<vmem>>) attributes {dimension_semantics = [], scalar_prefetch = 0 : i64, scratch_operands = 0 : i64, tpu.core_type = #tpu.core_type<tc>} {
    %c0 = arith.constant 0 : index
    %c0_0 = arith.constant 0 : index
    %0 = vector.load %arg1[%c0, %c0_0] : memref<76x128xf32, #tpu.memory_space<vmem>>, vector<8x128xf32>
    %c8 = arith.constant 8 : index
    %c0_1 = arith.constant 0 : index
    %1 = vector.load %arg1[%c8, %c0_1] : memref<76x128xf32, #tpu.memory_space<vmem>>, vector<32x128xf32>
    %c40 = arith.constant 40 : index
    %c0_2 = arith.constant 0 : index
    %2 = vector.load %arg1[%c40, %c0_2] : memref<76x128xf32, #tpu.memory_space<vmem>>, vector<1x128xf32>
    %c41 = arith.constant 41 : index
    %c0_3 = arith.constant 0 : index
    %3 = vector.load %arg1[%c41, %c0_3] : memref<76x128xf32, #tpu.memory_space<vmem>>, vector<32x128xf32>
    %c73 = arith.constant 73 : index
    %c0_4 = arith.constant 0 : index
    %4 = vector.load %arg1[%c73, %c0_4] : memref<76x128xf32, #tpu.memory_space<vmem>>, vector<1x128xf32>
    %c74 = arith.constant 74 : index
    %c0_5 = arith.constant 0 : index
    %5 = vector.load %arg1[%c74, %c0_5] : memref<76x128xf32, #tpu.memory_space<vmem>>, vector<1x128xf32>
    %c75 = arith.constant 75 : index
    %c0_6 = arith.constant 0 : index
    %6 = vector.load %arg1[%c75, %c0_6] : memref<76x128xf32, #tpu.memory_space<vmem>>, vector<1x128xf32>
    %c0_7 = arith.constant 0 : index
    %c0_8 = arith.constant 0 : index
    %7 = vector.load %arg0[%c0_7, %c0_8] : memref<8x8xf32, #tpu.memory_space<vmem>>, vector<8x8xf32>
    %cst = arith.constant dense<0.000000e+00> : vector<8x128xf32>
    %8 = tpu.matmul %7, %0, %cst {dimension_numbers = #tpu.dot_dimension_numbers<[1], [0], [0], [1], [0, 0, 1, 1], [], []>, precision = #tpu.contract_precision<fp32>} : vector<8x8xf32>, vector<8x128xf32>, vector<8x128xf32> -> vector<8x128xf32>
    %9 = vector.broadcast %2 : vector<1x128xf32> to vector<8x128xf32>
    %10 = arith.addf %8, %9 : vector<8x128xf32>
    %cst_9 = arith.constant 0.000000e+00 : f32
    %11 = vector.broadcast %cst_9 : f32 to vector<1x32xf32>
    %cst_10 = arith.constant 0.000000e+00 : f32
    %12 = vector.broadcast %cst_10 : f32 to vector<1x32xf32>
    %13 = vector.extract_strided_slice %10 {offsets = [0, 0], sizes = [1, 128], strides = [1, 1]} : vector<8x128xf32> to vector<1x128xf32>
    %cst_11 = arith.constant dense<0.000000e+00> : vector<1x128xf32>
    %14 = tpu.matmul %11, %1, %cst_11 {dimension_numbers = #tpu.dot_dimension_numbers<[1], [0], [0], [1], [0, 0, 1, 1], [], []>, precision = #tpu.contract_precision<fp32>} : vector<1x32xf32>, vector<32x128xf32>, vector<1x128xf32> -> vector<1x128xf32>
    %15 = arith.addf %13, %14 : vector<1x128xf32>
    %16 = math.tanh %15 : vector<1x128xf32>
    %17 = arith.mulf %16, %5 : vector<1x128xf32>
    %18 = arith.addf %17, %6 : vector<1x128xf32>
    %19 = vector.extract_strided_slice %18 {offsets = [0, 0], sizes = [1, 32], strides = [1, 1]} : vector<1x128xf32> to vector<1x32xf32>
    %20 = vector.extract_strided_slice %18 {offsets = [0, 32], sizes = [1, 32], strides = [1, 1]} : vector<1x128xf32> to vector<1x32xf32>
    %21 = vector.extract_strided_slice %18 {offsets = [0, 64], sizes = [1, 32], strides = [1, 1]} : vector<1x128xf32> to vector<1x32xf32>
    %22 = vector.extract_strided_slice %18 {offsets = [0, 96], sizes = [1, 32], strides = [1, 1]} : vector<1x128xf32> to vector<1x32xf32>
    %23 = arith.mulf %20, %12 : vector<1x32xf32>
    %24 = arith.mulf %19, %21 : vector<1x32xf32>
    %25 = arith.addf %23, %24 : vector<1x32xf32>
    %26 = math.tanh %25 : vector<1x32xf32>
    %27 = arith.mulf %22, %26 : vector<1x32xf32>
    %28 = vector.extract_strided_slice %10 {offsets = [1, 0], sizes = [1, 128], strides = [1, 1]} : vector<8x128xf32> to vector<1x128xf32>
    %cst_12 = arith.constant dense<0.000000e+00> : vector<1x128xf32>
    %29 = tpu.matmul %27, %1, %cst_12 {dimension_numbers = #tpu.dot_dimension_numbers<[1], [0], [0], [1], [0, 0, 1, 1], [], []>, precision = #tpu.contract_precision<fp32>} : vector<1x32xf32>, vector<32x128xf32>, vector<1x128xf32> -> vector<1x128xf32>
    %30 = arith.addf %28, %29 : vector<1x128xf32>
    %31 = math.tanh %30 : vector<1x128xf32>
    %32 = arith.mulf %31, %5 : vector<1x128xf32>
    %33 = arith.addf %32, %6 : vector<1x128xf32>
    %34 = vector.extract_strided_slice %33 {offsets = [0, 0], sizes = [1, 32], strides = [1, 1]} : vector<1x128xf32> to vector<1x32xf32>
    %35 = vector.extract_strided_slice %33 {offsets = [0, 32], sizes = [1, 32], strides = [1, 1]} : vector<1x128xf32> to vector<1x32xf32>
    %36 = vector.extract_strided_slice %33 {offsets = [0, 64], sizes = [1, 32], strides = [1, 1]} : vector<1x128xf32> to vector<1x32xf32>
    %37 = vector.extract_strided_slice %33 {offsets = [0, 96], sizes = [1, 32], strides = [1, 1]} : vector<1x128xf32> to vector<1x32xf32>
    %38 = arith.mulf %35, %25 : vector<1x32xf32>
    %39 = arith.mulf %34, %36 : vector<1x32xf32>
    %40 = arith.addf %38, %39 : vector<1x32xf32>
    %41 = math.tanh %40 : vector<1x32xf32>
    %42 = arith.mulf %37, %41 : vector<1x32xf32>
    %43 = vector.extract_strided_slice %10 {offsets = [2, 0], sizes = [1, 128], strides = [1, 1]} : vector<8x128xf32> to vector<1x128xf32>
    %cst_13 = arith.constant dense<0.000000e+00> : vector<1x128xf32>
    %44 = tpu.matmul %42, %1, %cst_13 {dimension_numbers = #tpu.dot_dimension_numbers<[1], [0], [0], [1], [0, 0, 1, 1], [], []>, precision = #tpu.contract_precision<fp32>} : vector<1x32xf32>, vector<32x128xf32>, vector<1x128xf32> -> vector<1x128xf32>
    %45 = arith.addf %43, %44 : vector<1x128xf32>
    %46 = math.tanh %45 : vector<1x128xf32>
    %47 = arith.mulf %46, %5 : vector<1x128xf32>
    %48 = arith.addf %47, %6 : vector<1x128xf32>
    %49 = vector.extract_strided_slice %48 {offsets = [0, 0], sizes = [1, 32], strides = [1, 1]} : vector<1x128xf32> to vector<1x32xf32>
    %50 = vector.extract_strided_slice %48 {offsets = [0, 32], sizes = [1, 32], strides = [1, 1]} : vector<1x128xf32> to vector<1x32xf32>
    %51 = vector.extract_strided_slice %48 {offsets = [0, 64], sizes = [1, 32], strides = [1, 1]} : vector<1x128xf32> to vector<1x32xf32>
    %52 = vector.extract_strided_slice %48 {offsets = [0, 96], sizes = [1, 32], strides = [1, 1]} : vector<1x128xf32> to vector<1x32xf32>
    %53 = arith.mulf %50, %40 : vector<1x32xf32>
    %54 = arith.mulf %49, %51 : vector<1x32xf32>
    %55 = arith.addf %53, %54 : vector<1x32xf32>
    %56 = math.tanh %55 : vector<1x32xf32>
    %57 = arith.mulf %52, %56 : vector<1x32xf32>
    %58 = vector.extract_strided_slice %10 {offsets = [3, 0], sizes = [1, 128], strides = [1, 1]} : vector<8x128xf32> to vector<1x128xf32>
    %cst_14 = arith.constant dense<0.000000e+00> : vector<1x128xf32>
    %59 = tpu.matmul %57, %1, %cst_14 {dimension_numbers = #tpu.dot_dimension_numbers<[1], [0], [0], [1], [0, 0, 1, 1], [], []>, precision = #tpu.contract_precision<fp32>} : vector<1x32xf32>, vector<32x128xf32>, vector<1x128xf32> -> vector<1x128xf32>
    %60 = arith.addf %58, %59 : vector<1x128xf32>
    %61 = math.tanh %60 : vector<1x128xf32>
    %62 = arith.mulf %61, %5 : vector<1x128xf32>
    %63 = arith.addf %62, %6 : vector<1x128xf32>
    %64 = vector.extract_strided_slice %63 {offsets = [0, 0], sizes = [1, 32], strides = [1, 1]} : vector<1x128xf32> to vector<1x32xf32>
    %65 = vector.extract_strided_slice %63 {offsets = [0, 32], sizes = [1, 32], strides = [1, 1]} : vector<1x128xf32> to vector<1x32xf32>
    %66 = vector.extract_strided_slice %63 {offsets = [0, 64], sizes = [1, 32], strides = [1, 1]} : vector<1x128xf32> to vector<1x32xf32>
    %67 = vector.extract_strided_slice %63 {offsets = [0, 96], sizes = [1, 32], strides = [1, 1]} : vector<1x128xf32> to vector<1x32xf32>
    %68 = arith.mulf %65, %55 : vector<1x32xf32>
    %69 = arith.mulf %64, %66 : vector<1x32xf32>
    %70 = arith.addf %68, %69 : vector<1x32xf32>
    %71 = math.tanh %70 : vector<1x32xf32>
    %72 = arith.mulf %67, %71 : vector<1x32xf32>
    %73 = vector.extract_strided_slice %10 {offsets = [4, 0], sizes = [1, 128], strides = [1, 1]} : vector<8x128xf32> to vector<1x128xf32>
    %cst_15 = arith.constant dense<0.000000e+00> : vector<1x128xf32>
    %74 = tpu.matmul %72, %1, %cst_15 {dimension_numbers = #tpu.dot_dimension_numbers<[1], [0], [0], [1], [0, 0, 1, 1], [], []>, precision = #tpu.contract_precision<fp32>} : vector<1x32xf32>, vector<32x128xf32>, vector<1x128xf32> -> vector<1x128xf32>
    %75 = arith.addf %73, %74 : vector<1x128xf32>
    %76 = math.tanh %75 : vector<1x128xf32>
    %77 = arith.mulf %76, %5 : vector<1x128xf32>
    %78 = arith.addf %77, %6 : vector<1x128xf32>
    %79 = vector.extract_strided_slice %78 {offsets = [0, 0], sizes = [1, 32], strides = [1, 1]} : vector<1x128xf32> to vector<1x32xf32>
    %80 = vector.extract_strided_slice %78 {offsets = [0, 32], sizes = [1, 32], strides = [1, 1]} : vector<1x128xf32> to vector<1x32xf32>
    %81 = vector.extract_strided_slice %78 {offsets = [0, 64], sizes = [1, 32], strides = [1, 1]} : vector<1x128xf32> to vector<1x32xf32>
    %82 = vector.extract_strided_slice %78 {offsets = [0, 96], sizes = [1, 32], strides = [1, 1]} : vector<1x128xf32> to vector<1x32xf32>
    %83 = arith.mulf %80, %70 : vector<1x32xf32>
    %84 = arith.mulf %79, %81 : vector<1x32xf32>
    %85 = arith.addf %83, %84 : vector<1x32xf32>
    %86 = math.tanh %85 : vector<1x32xf32>
    %87 = arith.mulf %82, %86 : vector<1x32xf32>
    %88 = vector.extract_strided_slice %10 {offsets = [5, 0], sizes = [1, 128], strides = [1, 1]} : vector<8x128xf32> to vector<1x128xf32>
    %cst_16 = arith.constant dense<0.000000e+00> : vector<1x128xf32>
    %89 = tpu.matmul %87, %1, %cst_16 {dimension_numbers = #tpu.dot_dimension_numbers<[1], [0], [0], [1], [0, 0, 1, 1], [], []>, precision = #tpu.contract_precision<fp32>} : vector<1x32xf32>, vector<32x128xf32>, vector<1x128xf32> -> vector<1x128xf32>
    %90 = arith.addf %88, %89 : vector<1x128xf32>
    %91 = math.tanh %90 : vector<1x128xf32>
    %92 = arith.mulf %91, %5 : vector<1x128xf32>
    %93 = arith.addf %92, %6 : vector<1x128xf32>
    %94 = vector.extract_strided_slice %93 {offsets = [0, 0], sizes = [1, 32], strides = [1, 1]} : vector<1x128xf32> to vector<1x32xf32>
    %95 = vector.extract_strided_slice %93 {offsets = [0, 32], sizes = [1, 32], strides = [1, 1]} : vector<1x128xf32> to vector<1x32xf32>
    %96 = vector.extract_strided_slice %93 {offsets = [0, 64], sizes = [1, 32], strides = [1, 1]} : vector<1x128xf32> to vector<1x32xf32>
    %97 = vector.extract_strided_slice %93 {offsets = [0, 96], sizes = [1, 32], strides = [1, 1]} : vector<1x128xf32> to vector<1x32xf32>
    %98 = arith.mulf %95, %85 : vector<1x32xf32>
    %99 = arith.mulf %94, %96 : vector<1x32xf32>
    %100 = arith.addf %98, %99 : vector<1x32xf32>
    %101 = math.tanh %100 : vector<1x32xf32>
    %102 = arith.mulf %97, %101 : vector<1x32xf32>
    %103 = vector.extract_strided_slice %10 {offsets = [6, 0], sizes = [1, 128], strides = [1, 1]} : vector<8x128xf32> to vector<1x128xf32>
    %cst_17 = arith.constant dense<0.000000e+00> : vector<1x128xf32>
    %104 = tpu.matmul %102, %1, %cst_17 {dimension_numbers = #tpu.dot_dimension_numbers<[1], [0], [0], [1], [0, 0, 1, 1], [], []>, precision = #tpu.contract_precision<fp32>} : vector<1x32xf32>, vector<32x128xf32>, vector<1x128xf32> -> vector<1x128xf32>
    %105 = arith.addf %103, %104 : vector<1x128xf32>
    %106 = math.tanh %105 : vector<1x128xf32>
    %107 = arith.mulf %106, %5 : vector<1x128xf32>
    %108 = arith.addf %107, %6 : vector<1x128xf32>
    %109 = vector.extract_strided_slice %108 {offsets = [0, 0], sizes = [1, 32], strides = [1, 1]} : vector<1x128xf32> to vector<1x32xf32>
    %110 = vector.extract_strided_slice %108 {offsets = [0, 32], sizes = [1, 32], strides = [1, 1]} : vector<1x128xf32> to vector<1x32xf32>
    %111 = vector.extract_strided_slice %108 {offsets = [0, 64], sizes = [1, 32], strides = [1, 1]} : vector<1x128xf32> to vector<1x32xf32>
    %112 = vector.extract_strided_slice %108 {offsets = [0, 96], sizes = [1, 32], strides = [1, 1]} : vector<1x128xf32> to vector<1x32xf32>
    %113 = arith.mulf %110, %100 : vector<1x32xf32>
    %114 = arith.mulf %109, %111 : vector<1x32xf32>
    %115 = arith.addf %113, %114 : vector<1x32xf32>
    %116 = math.tanh %115 : vector<1x32xf32>
    %117 = arith.mulf %112, %116 : vector<1x32xf32>
    %118 = vector.extract_strided_slice %10 {offsets = [7, 0], sizes = [1, 128], strides = [1, 1]} : vector<8x128xf32> to vector<1x128xf32>
    %cst_18 = arith.constant dense<0.000000e+00> : vector<1x128xf32>
    %119 = tpu.matmul %117, %1, %cst_18 {dimension_numbers = #tpu.dot_dimension_numbers<[1], [0], [0], [1], [0, 0, 1, 1], [], []>, precision = #tpu.contract_precision<fp32>} : vector<1x32xf32>, vector<32x128xf32>, vector<1x128xf32> -> vector<1x128xf32>
    %120 = arith.addf %118, %119 : vector<1x128xf32>
    %121 = math.tanh %120 : vector<1x128xf32>
    %122 = arith.mulf %121, %5 : vector<1x128xf32>
    %123 = arith.addf %122, %6 : vector<1x128xf32>
    %124 = vector.extract_strided_slice %123 {offsets = [0, 0], sizes = [1, 32], strides = [1, 1]} : vector<1x128xf32> to vector<1x32xf32>
    %125 = vector.extract_strided_slice %123 {offsets = [0, 32], sizes = [1, 32], strides = [1, 1]} : vector<1x128xf32> to vector<1x32xf32>
    %126 = vector.extract_strided_slice %123 {offsets = [0, 64], sizes = [1, 32], strides = [1, 1]} : vector<1x128xf32> to vector<1x32xf32>
    %127 = vector.extract_strided_slice %123 {offsets = [0, 96], sizes = [1, 32], strides = [1, 1]} : vector<1x128xf32> to vector<1x32xf32>
    %128 = arith.mulf %125, %115 : vector<1x32xf32>
    %129 = arith.mulf %124, %126 : vector<1x32xf32>
    %130 = arith.addf %128, %129 : vector<1x32xf32>
    %131 = math.tanh %130 : vector<1x32xf32>
    %132 = arith.mulf %127, %131 : vector<1x32xf32>
    %cst_19 = arith.constant dense<0.000000e+00> : vector<1x128xf32>
    %133 = tpu.matmul %132, %3, %cst_19 {dimension_numbers = #tpu.dot_dimension_numbers<[1], [0], [0], [1], [0, 0, 1, 1], [], []>, precision = #tpu.contract_precision<fp32>} : vector<1x32xf32>, vector<32x128xf32>, vector<1x128xf32> -> vector<1x128xf32>
    %134 = arith.addf %133, %4 : vector<1x128xf32>
    %c0_20 = arith.constant 0 : index
    %c0_21 = arith.constant 0 : index
    %135 = vector.load %arg2[%c0_20, %c0_21] : memref<1x128xf32, #tpu.memory_space<vmem>>, vector<1x128xf32>
    tpu.vector_store %arg2[%c0_20, %c0_21], %134 {strides = array<i32>} : memref<1x128xf32, #tpu.memory_space<vmem>>, vector<1x128xf32>,
    return
  }
}

</mosaic_0001>

<bundles_post_ra>
// kernel: tpu_custom_call.1
= control target key start
LH: loop header
LB: loop body
LE: loop exit
PB: predicated region body
PF: predicated region fallthrough
CT: control target
= control target key end

     0   :  { %7 = vsyncpa [#allocation3], 0  ;;  %s7151_s0 = inlined_call_operand.hbm [shape: f32[8,8], index: 0, kind: input, shape index: {}]   ;;  %s7152_s1 = inlined_call_operand.hbm [shape: f32[76,128], index: 1, kind: input, shape index: {}]   ;;  %s7153_s2 = inlined_call_operand.hbm [shape: f32[1,128], index: 2, kind: output, shape index: {}]  }
   0x1   :  { %8 = vsyncpa [#allocation6], 0 }
   0x2   :  { %9 = vsyncpa [#allocation4], 0  ;;  %s6615_s9 = smov [#allocation2]   ;;  %s6616_s11 = smov [#allocation5]  }
   0x3   :  { %s16_s10 = sshll.u32 %s6615_s9, 4  ;;  %s25_s12 = sshll.u32 %s6616_s11, 4  ;;  %s17_s10 = int_to_ptr.vmem [resolvable:$true] %s16_s10  ;;  %s6640_s12 = int_to_ptr.vmem [resolvable:$true] %s25_s12 }
   0x4   :  { %s6543_s15 = scalar_lea.hbm %s7151_s0, 128 }
   0x5   :  { %p6544_p0 = scmp.ne.s32.totalorder %s7151_s0, %s6543_s15  ;;  %p6547_p1 = scmp.lt.u32.totalorder %s6543_s15, %s7151_s0 }
   0x7   :  { %p6549_p2 = pnand %p6547_p1, %p6544_p0 }
   0x9   :  { %6552 = shalt.err (!%p6549_p2)
}
   0xa   :  { %s6553_s20 = scalar_lea.vmem %s17_s10, 128  ;;  %p6558_p4 = scmp.lt.s32.totalorder %s17_s10, %s17_s10 }
   0xb   :  { %p6554_p3 = scmp.ne.s32.totalorder %s17_s10, %s6553_s20  ;;  %p6559_p5 = scmp.lt.s32.totalorder %s6553_s20, %s6553_s20 }
   0xd   :  { %p6560_p6 = por %p6559_p5, %p6558_p4 }
   0xf   :  { %p6561_p7 = pnand %p6560_p6, %p6554_p3 }
  0x11   :  { %6564 = shalt.err (!%p6561_p7)
}
  0x12   :  { %19 = dma.hbm_to_vmem [thread:$0]  %s7151_s0, 128, %s17_s10, [#allocation3]  }
  0x13   :  { %s6565_s25 = scalar_lea.hbm %s7152_s1, 1280 }
  0x14   :  { %p6566_p8 = scmp.ne.s32.totalorder %s7152_s1, %s6565_s25  ;;  %p6569_p9 = scmp.lt.u32.totalorder %s6565_s25, %s7152_s1 }
  0x16   :  { %p6571_p10 = pnand %p6569_p9, %p6566_p8 }
  0x18   :  { %6574 = shalt.err (!%p6571_p10)
}
  0x19   :  { %s6575_s30 = scalar_lea.vmem %s6640_s12, 1280  ;;  %p6580_p12 = scmp.lt.s32.totalorder %s6640_s12, %s6640_s12 }
  0x1a   :  { %p6576_p11 = scmp.ne.s32.totalorder %s6640_s12, %s6575_s30  ;;  %p6581_p13 = scmp.lt.s32.totalorder %s6575_s30, %s6575_s30 }
  0x1c   :  { %p6582_p0 = por %p6581_p13, %p6580_p12 }
  0x1e   :  { %p6583_p1 = pnand %p6582_p0, %p6576_p11 }
  0x20   :  { %6586 = shalt.err (!%p6583_p1)
}
  0x21   :  { %s6617_s0 = smov 128   ;;  %s6618_s3 = smov 8  }
  0x22   :  { %31 = dma.hbm_to_vmem [thread:$0]  %s7152_s1, 1280, %s6640_s12, [#allocation6], %s6617_s0, %s6617_s0, %s6618_s3  }
  0x23   :  { %6609 = dma.done.wait [#allocation3], 128  }
  0x24   :  { %6610 = vsyncadd [#allocation3], 4294967168 }
  0x25   :  { %6611 = dma.done.wait [#allocation6], 1280  }
  0x26   :  { %6612 = vsyncadd [#allocation6], 4294966016  ;;  %v6619_v0 = vmov 0.0   ;;  %vm6620_vm0 = vmmov 0   ;;  %vm56_vm1 = vcmask 64512   ;;  %v38_v1 = vld [vmem:[#allocation5] sm:$0xff] }
  0x27   :  { %5467 = vmatprep.subr.mxu0 %v6619_v0  ;;  %5462 = vmatprep.subr.mxu1 %v6619_v0  ;;  %v51_v2 = vld [vmem:[#allocation2] sm:$0xff]  ;;  %v39_v3 = vld [vmem:[#allocation5 + $0x8] sm:$0xff]  ;;  %v6677_v4 = vand.u32 4294901760, %v38_v1  ;;  %v40_v6 = vld [vmem:[#allocation5 + $0x10] sm:$0xff]  ;;  %v6621_v16 = vmov 0.0|0.0   ;;  %s6622_s1 = smov 64  }
  0x28   :  { %5469 = vmatprep.mubr.msk.f32.mxu0 %vm6620_vm0, %v6619_v0  ;;  %5464 = vmatprep.mubr.msk.f32.mxu1 %vm6620_vm0, %v6619_v0  ;;  %v58_v5 = vsel %vm56_vm1, %v51_v2, 0  ;;  %v511_v7 = vand.u32 4294901760, %v39_v3  ;;  %v41_v8 = vld [vmem:[#allocation5 + $0x18] sm:$0xff]  ;;  %v42_v9 = vld [vmem:[#allocation5 + $0x20] sm:$0xff]  ;;  %v514_v11 = vand.u32 4294901760, %v40_v6  ;;  %s6623_s6 = smov 32  }
  0x29   :  { %v6679_v10 = vand.u32 4294901760, %v58_v5  ;;  %v517_v12 = vand.u32 4294901760, %v41_v8  ;;  %v520_v13 = vand.u32 4294901760, %v42_v9  ;;  %v138_v14 = vsub.f32 %v38_v1, %v6677_v4  ;;  %5463 = vmatpush3.msra.mxu1 %v6677_v4  ;;  %v5179_v57 = vld [vmem:[#allocation5 + $0x28] ss:$0 sm:$0xff]  ;;  %s6624_s7 = smov [#allocation7]  }
  0x2a   :  { %v6683_v15 = vsub.f32 %v39_v3, %v511_v7  ;;  %6086 = vmatprep.subr.bf16.mxu1 %v6621_v16  ;;  %v598_v18 = vsub.f32 %v40_v6, %v514_v11  ;;  %v6688_v28 = vpack.c.bf16 %v514_v11, %v511_v7  ;;  %v6783_v11 = vld [vmem:[#allocation5 + $0x4b] sm:$0x1]  ;;  %vm506_vm2 = vcmask 261120   ;;  %s5169_s8 = sshll.u32 %s6624_s7, 4  ;;  %s5170_s8 = int_to_ptr.vmem [resolvable:$true] %s5169_s8 }
  0x2b   :  { %v127_v17 = vsub.f32 %v58_v5, %v6679_v10  ;;  %v139_v19 = vand.u32 4294901760, %v138_v14  ;;  %v605_v23 = vsub.f32 %v41_v8, %v517_v12  ;;  %v612_v24 = vsub.f32 %v42_v9, %v520_v13  ;;  %v6781_v9 = vld [vmem:[#allocation5 + $0x4a] sm:$0x1]  ;;  %s6587_s9 = scalar_lea.vmem %s5170_s8, 16  ;;  %s6591_s10 = scalar_lea.vmem %s5170_s8, 32 }
  0x2c   :  { %v592_v20 = vand.u32 4294901760, %v6683_v15  ;;  %v599_v22 = vand.u32 4294901760, %v598_v18  ;;  %v6693_v34 = vpack.c.bf16 %v520_v13, %v517_v12  ;;  %v6719_v43 = vpack.c.bf16 %v598_v18, %v6683_v15  ;;  %p6588_p2 = scmp.ne.s32.totalorder %s5170_s8, %s6587_s9  ;;  %p6592_p3 = scmp.lt.s32.totalorder %s5170_s8, %s5170_s8 }
  0x2d   :  { %v128_v21 = vand.u32 4294901760, %v127_v17  ;;  %v140_v25 = vsub.f32 %v138_v14, %v139_v19  ;;  %v606_v32 = vand.u32 4294901760, %v605_v23  ;;  %v613_v33 = vand.u32 4294901760, %v612_v24  ;;  %p6593_p4 = scmp.lt.s32.totalorder %s6591_s10, %s6587_s9 }
  0x2e   :  { %v593_v29 = vsub.f32 %v6683_v15, %v592_v20  ;;  %v600_v31 = vsub.f32 %v598_v18, %v599_v22  ;;  %v6724_v44 = vpack.c.bf16 %v612_v24, %v605_v23  ;;  %v6734_v45 = vpack.c.bf16 %v599_v22, %v592_v20 }
  0x2f   :  { %v129_v26 = vsub.f32 %v127_v17, %v128_v21  ;;  %v141_v27 = vand.u32 4294901760, %v140_v25  ;;  %v607_v37 = vsub.f32 %v605_v23, %v606_v32  ;;  %v614_v38 = vsub.f32 %v612_v24, %v613_v33  ;;  %p6594_p5 = por %p6593_p4, %p6592_p3 }
  0x30   :  { %v594_v35 = vand.u32 4294901760, %v593_v29  ;;  %v601_v36 = vand.u32 4294901760, %v600_v31  ;;  %v6743_v46 = vpack.c.bf16 %v613_v33, %v606_v32 }
  0x31   :  { %v130_v30 = vand.u32 4294901760, %v129_v26  ;;  %5468 = vmatpush3.msra.mxu0 %v141_v27  ;;  %v608_v40 = vand.u32 4294901760, %v607_v37  ;;  %v615_v41 = vand.u32 4294901760, %v614_v38  ;;  %v1516_v37 = vrot.slane %v6783_v11, 7  ;;  %p6595_p6 = pnand %p6594_p5, %p6588_p2 }
  0x32   :  { %5470 = vmatmul.mubr.f32.vlgmr.msra.gmra.mrb[0].mxu0 %v6679_v10  ;;  %5472 = vmatprep.subr.mxu0 %v6619_v0  ;;  %v6703_v39 = vpack.c.bf16 %v601_v36, %v594_v35  ;;  %v1512_v36 = vrot.slane %v6781_v9, 7 }
  0x33   :  { %5473 = vmatpush3.msra.mxu0 %v138_v14  ;;  %5465 = vmatmul.mubr.f32.vlgmr.msra.gmra.mrb[0].mxu1 %v130_v30  ;;  %v6709_v42 = vpack.c.bf16 %v615_v41, %v608_v40 }
  0x34   :  { %6088 = vmatpush3.bf16.msra.mxu1 %v6688_v28  ;;  %5474 = vmatprep.mubr.msk.f32.mxu0 %vm6620_vm0, %v6619_v0 }
  0x35   :  { %6089 = vmatprep.subr.bf16.mxu1 %v6621_v16  ;;  %5477 = vmatprep.subr.mxu0 %v6619_v0 }
  0x36   :  { %5500 = vmatprep.mubr.msk.f32.mxu1 %vm6620_vm0, %v6619_v0 }
  0x38   :  { %6091 = vmatpush3.bf16.msra.mxu1 %v6693_v34 }
  0x39   :  { %6092 = vmatprep.subr.bf16.mxu1 %v6621_v16 }
  0x3a   :  { %5475 = vmatmul.mubr.f32.vlgmr.msra.gmra.mrb[0].mxu0 %v127_v17 }
  0x3b   :  { %5478 = vmatpush3.msra.mxu0 %v6677_v4  ;;  %5501 = vmatmul.mubr.f32.vlgmr.msra.gmra.mrb[2].mxu1 %v6619_v0 }
  0x3c   :  { %6094 = vmatpush3.bf16.msra.mxu1 %v6703_v39  ;;  %5479 = vmatprep.mubr.msk.f32.mxu0 %vm6620_vm0, %v6619_v0 }
  0x3d   :  { %6095 = vmatprep.subr.bf16.mxu1 %v6621_v16  ;;  %5482 = vmatprep.subr.mxu0 %v6619_v0 }
  0x3e   :  { %5511 = vmatprep.mubr.msk.f32.mxu1 %vm6620_vm0, %v6619_v0 }
  0x40   :  { %6097 = vmatpush3.bf16.msra.mxu1 %v6709_v42 }
  0x41   :  { %6098 = vmatprep.subr.bf16.mxu1 %v6621_v16 }
  0x42   :  { %5480 = vmatmul.mubr.f32.vlgmr.msra.gmra.mrb[0].mxu0 %v128_v21 }
  0x43   :  { %5483 = vmatpush3.msra.mxu0 %v139_v19  ;;  %5512 = vmatmul.mubr.f32.vlgmr.msra.gmra.mrb[4].mxu1 %v6619_v0 }
  0x44   :  { %6100 = vmatpush3.bf16.msra.mxu1 %v6719_v43  ;;  %5484 = vmatprep.mubr.msk.f32.mxu0 %vm6620_vm0, %v6619_v0 }
  0x45   :  { %6101 = vmatprep.subr.bf16.mxu1 %v6621_v16  ;;  %5487 = vmatprep.subr.mxu0 %v6619_v0 }
  0x46   :  { %5522 = vmatprep.mubr.msk.f32.mxu1 %vm6620_vm0, %v6619_v0 }
  0x48   :  { %6103 = vmatpush3.bf16.msra.mxu1 %v6724_v44 }
  0x49   :  { %6110 = vmatprep.subr.bf16.mxu1 %v6621_v16 }
  0x4a   :  { %5485 = vmatmul.mubr.f32.vlgmr.msra.gmra.mrb[0].mxu0 %v6679_v10 }
  0x4b   :  { %5488 = vmatpush3.msra.mxu0 %v6677_v4  ;;  %5523 = vmatmul.mubr.f32.vlgmr.msra.gmra.mrb[6].mxu1 %v6619_v0 }
  0x4c   :  { %5489 = vmatprep.mubr.msk.f32.mxu0 %vm6620_vm0, %v6619_v0  ;;  %6104 = vmatprep.subr.bf16.mxu0 %v6621_v16 }
  0x4d   :  { %6112 = vmatpush3.bf16.msra.mxu1 %v6734_v45  ;;  %5544 = vmatprep.mubr.msk.f32.mxu1 %vm6620_vm0, %v6619_v0 }
  0x4e   :  { %6113 = vmatprep.subr.bf16.mxu1 %v6621_v16 }
  0x51   :  { %6115 = vmatpush3.bf16.msra.mxu1 %v6743_v46 }
  0x52   :  { %5490 = vmatmul.mubr.f32.vlgmr.msra.gmra.mrb[0].mxu0 %v6679_v10  ;;  %6122 = vmatprep.subr.bf16.mxu1 %v6621_v16 }
  0x53   :  { %6106 = vmatpush3.bf16.msra.mxu0 %v6688_v28  ;;  %5533 = vmatprep.mubr.msk.f32.mxu0 %vm6620_vm0, %v6619_v0 }
  0x54   :  { %6107 = vmatprep.subr.bf16.mxu0 %v6621_v16  ;;  %5545 = vmatmul.mubr.f32.vlgmr.msra.gmra.mrb[8].mxu1 %v6619_v0 }
  0x55   :  { %6124 = vmatpush3.bf16.msra.mxu1 %v6688_v28  ;;  %5566 = vmatprep.mubr.msk.f32.mxu1 %vm6620_vm0, %v6619_v0 }
  0x56   :  { %6125 = vmatprep.subr.bf16.mxu1 %v6621_v16 }
  0x57   :  { %6109 = vmatpush3.bf16.msra.mxu0 %v6693_v34 }
  0x58   :  { %6116 = vmatprep.subr.bf16.mxu0 %v6621_v16 }
  0x59   :  { %6127 = vmatpush3.bf16.msra.mxu1 %v6693_v34 }
  0x5a   :  { %5534 = vmatmul.mubr.f32.vlgmr.msra.gmra.mrb[2].mxu0 %v6619_v0  ;;  %6128 = vmatprep.subr.bf16.mxu1 %v6621_v16 }
  0x5b   :  { %6118 = vmatpush3.bf16.msra.mxu0 %v6688_v28  ;;  %5555 = vmatprep.mubr.msk.f32.mxu0 %vm6620_vm0, %v6619_v0 }
  0x5c   :  { %6119 = vmatprep.subr.bf16.mxu0 %v6621_v16 }
  0x5f   :  { %6121 = vmatpush3.bf16.msra.mxu0 %v6693_v34 }
  0x60   :  { %6158 = vmatprep.subr.bf16.mxu0 %v6621_v16 }
  0x62   :  { %5556 = vmatmul.mubr.f32.vlgmr.msra.gmra.mrb[4].mxu0 %v6619_v0 }
  0x63   :  { %6160 = vmatpush3.bf16.msra.mxu0 %v6688_v28  ;;  %5632 = vmatprep.mubr.msk.f32.mxu0 %vm6620_vm0, %v6619_v0 }
  0x64   :  { %6161 = vmatprep.subr.bf16.mxu0 %v6621_v16 }
  0x67   :  { %6163 = vmatpush3.bf16.msra.mxu0 %v6693_v34 }
  0x68   :  { %6164 = vmatprep.subr.bf16.mxu0 %v6621_v16 }
 0x106   :  { %v132_v47 = vpop.f32.mrb[0].mxu1 }
 0x107   :  { %v5466_v48 = vpop.f32.mrb[1].mxu1  ;;  %v133_v58 = vadd.f32 %v5179_v57, %v132_v47 }
 0x10e   :  { %v585_v49 = vpop.f32.mrb[2].mxu1 }
 0x10f   :  { %v5502_v50 = vpop.f32.mrb[3].mxu1 }
 0x116   :  { %v676_v51 = vpop.f32.mrb[4].mxu1 }
 0x117   :  { %v677_v52 = vadd.f32 %v676_v51, %v585_v49  ;;  %v5513_v53 = vpop.f32.mrb[5].mxu1 }
 0x11e   :  { %v756_v54 = vpop.f32.mrb[6].mxu1 }
 0x11f   :  { %v757_v55 = vadd.f32 %v756_v54, %v677_v52  ;;  %v5524_v56 = vpop.f32.mrb[7].mxu1 }
 0x125   :  { %v502_v59 = vpop.f32.mrb[0].mxu0 }
 0x126   :  { %v6778_v60 = vadd.f32 %v502_v59, %v133_v58  ;;  %v5491_v61 = vpop.f32.mrb[1].mxu0 }
 0x127   :  { %v916_v62 = vpop.f32.mrb[8].mxu1 }
 0x128   :  { %v5546_v63 = vpop.f32.mrb[9].mxu1 }
 0x12d   :  { %v833_v1 = vpop.f32.mrb[2].mxu0 }
 0x12e   :  { %v834_v2 = vadd.f32 %v833_v1, %v757_v55  ;;  %v5535_v3 = vpop.f32.mrb[3].mxu0 }
 0x130   :  { %v917_v4 = vadd.f32 %v916_v62, %v834_v2 }
 0x135   :  { %v991_v5 = vpop.f32.mrb[4].mxu0 }
 0x136   :  { %v992_v6 = vadd.f32 %v991_v5, %v917_v4  ;;  %v5557_v7 = vpop.f32.mrb[5].mxu0 }
 0x137   :  { %v2038_v7 = vrot.slane %v6783_v11, 6 }
 0x138   :  { %v995_v8 = vadd.f32 %v6778_v60, %v992_v6  ;;  %v2035_v6 = vrot.slane %v6781_v9, 6 }
 0x13a   :  { %6511 = vtanh.f32 %v995_v8 }
 0x144   :  { %v6512_v10 = vpop.eup %6511 }
 0x145   :  { %v997_v12 = vmul.f32 %v6512_v10, %v6781_v9 }
 0x147   :  { %v998_v13 = vadd.f32 %v997_v12, %v6783_v11 }
 0x149   :  { %1001 = vrot.lane.b32.xlu0 %v998_v13, %s6622_s1  ;;  %v999_v17 = vmul.f32 0.0, %v998_v13 }
 0x1bb   :  { %v1002_v14 = vpop.permute.xlu0 %1001 }
 0x1bc   :  { %v1004_v15 = vmul.f32 %v1002_v14, %v998_v13 }
 0x1be   :  { %1006 = vrot.lane.b32.xlu0 %v1004_v15, %s6623_s6 }
 0x230   :  { %v1007_v18 = vpop.permute.xlu0 %1006 }
 0x231   :  { %v6789_v19 = vadd.f32 %v1007_v18, %v999_v17 }
 0x233   :  { %6513 = vtanh.f32 %v6789_v19  ;;  %v1520_v49 = vrot.slane %v6789_v19, 7 }
 0x23d   :  { %v6514_v20 = vpop.eup %6513 }
 0x23e   :  { %1012 = vrot.lane.b32.xlu1 %v6514_v20, %s6622_s1 }
 0x2b0   :  { %v1013_v21 = vpop.permute.xlu1 %1012 }
 0x2b1   :  { %v1015_v22 = vmul.f32 %v1013_v21, %v998_v13 }
 0x2b3   :  { %1017 = vrot.lane.b32.xlu1 %v1015_v22, %s6623_s6 }
 0x325   :  { %v1018_v23 = vpop.permute.xlu1 %1017 }
 0x326   :  { %v1019_v24 = vsel %vm506_vm2, %v1018_v23, 0 }
 0x327   :  { %v1090_v25 = vand.u32 4294901760, %v1019_v24 }
 0x329   :  { %v1091_v26 = vsub.f32 %v1019_v24, %v1090_v25 }
 0x32b   :  { %v1092_v27 = vand.u32 4294901760, %v1091_v26 }
 0x32d   :  { %v1093_v29 = vsub.f32 %v1091_v26, %v1092_v27 }
 0x32f   :  { %v1094_v30 = vand.u32 4294901760, %v1093_v29 }
 0x331   :  { %5567 = vmatmul.mubr.f32.vlgmr.msra.gmra.mrb[10].mxu1 %v1094_v30 }
 0x332   :  { %6130 = vmatpush3.bf16.msra.mxu1 %v6703_v39  ;;  %5577 = vmatprep.mubr.msk.f32.mxu1 %vm6620_vm0, %v6619_v0 }
 0x333   :  { %6131 = vmatprep.subr.bf16.mxu1 %v6621_v16 }
 0x336   :  { %6133 = vmatpush3.bf16.msra.mxu1 %v6709_v42 }
 0x337   :  { %6134 = vmatprep.subr.bf16.mxu1 %v6621_v16 }
 0x339   :  { %5578 = vmatmul.mubr.f32.vlgmr.msra.gmra.mrb[10].mxu1 %v1090_v25 }
 0x33a   :  { %6136 = vmatpush3.bf16.msra.mxu1 %v6719_v43  ;;  %5588 = vmatprep.mubr.msk.f32.mxu1 %vm6620_vm0, %v6619_v0 }
 0x33b   :  { %6137 = vmatprep.subr.bf16.mxu1 %v6621_v16 }
 0x33e   :  { %6139 = vmatpush3.bf16.msra.mxu1 %v6724_v44 }
 0x33f   :  { %6140 = vmatprep.subr.bf16.mxu1 %v6621_v16 }
 0x341   :  { %5589 = vmatmul.mubr.f32.vlgmr.msra.gmra.mrb[10].mxu1 %v1091_v26 }
 0x342   :  { %6142 = vmatpush3.bf16.msra.mxu1 %v6688_v28  ;;  %5599 = vmatprep.mubr.msk.f32.mxu1 %vm6620_vm0, %v6619_v0 }
 0x343   :  { %6143 = vmatprep.subr.bf16.mxu1 %v6621_v16 }
 0x346   :  { %6145 = vmatpush3.bf16.msra.mxu1 %v6693_v34 }
 0x347   :  { %6146 = vmatprep.subr.bf16.mxu1 %v6621_v16 }
 0x349   :  { %5600 = vmatmul.mubr.f32.vlgmr.msra.gmra.mrb[10].mxu1 %v1092_v27 }
 0x34a   :  { %6148 = vmatpush3.bf16.msra.mxu1 %v6734_v45  ;;  %5610 = vmatprep.mubr.msk.f32.mxu1 %vm6620_vm0, %v6619_v0 }
 0x34b   :  { %6149 = vmatprep.subr.bf16.mxu1 %v6621_v16 }
 0x34e   :  { %6151 = vmatpush3.bf16.msra.mxu1 %v6743_v46 }
 0x34f   :  { %6152 = vmatprep.subr.bf16.mxu1 %v6621_v16 }
 0x351   :  { %5611 = vmatmul.mubr.f32.vlgmr.msra.gmra.mrb[10].mxu1 %v1090_v25 }
 0x352   :  { %6154 = vmatpush3.bf16.msra.mxu1 %v6688_v28  ;;  %5621 = vmatprep.mubr.msk.f32.mxu1 %vm6620_vm0, %v6619_v0 }
 0x353   :  { %6155 = vmatprep.subr.bf16.mxu1 %v6621_v16 }
 0x356   :  { %6157 = vmatpush3.bf16.msra.mxu1 %v6693_v34 }
 0x357   :  { %6194 = vmatprep.subr.bf16.mxu1 %v6621_v16 }
 0x359   :  { %5622 = vmatmul.mubr.f32.vlgmr.msra.gmra.mrb[10].mxu1 %v1090_v25 }
 0x35a   :  { %6196 = vmatpush3.bf16.msra.mxu1 %v6688_v28  ;;  %5698 = vmatprep.mubr.msk.f32.mxu1 %vm6620_vm0, %v6619_v0 }
 0x35b   :  { %6197 = vmatprep.subr.bf16.mxu1 %v6621_v16 }
 0x35e   :  { %6199 = vmatpush3.bf16.msra.mxu1 %v6693_v34 }
 0x35f   :  { %6200 = vmatprep.subr.bf16.mxu1 %v6621_v16 }
 0x42c   :  { %v1502_v31 = vpop.f32.mrb[10].mxu1 }
 0x42d   :  { %v1507_v32 = vrot.slane %v1502_v31, 7  ;;  %v5623_v33 = vpop.f32.mrb[11].mxu1 }
 0x42f   :  { %v1509_v35 = vadd.f32 %v6778_v60, %v1507_v32 }
 0x431   :  { %6515 = vtanh.f32 %v1509_v35 }
 0x43b   :  { %v6516_v38 = vpop.eup %6515 }
 0x43c   :  { %v1514_v40 = vmul.f32 %v6516_v38, %v1512_v36  ;;  %v2560_v38 = vrot.slane %v6783_v11, 5 }
 0x43e   :  { %v1518_v41 = vadd.f32 %v1516_v37, %v1514_v40  ;;  %v2557_v37 = vrot.slane %v6781_v9, 5 }
 0x440   :  { %1524 = vrot.lane.b32.xlu0 %v1518_v41, %s6622_s1  ;;  %v1522_v50 = vmul.f32 %v1520_v49, %v1518_v41 }
 0x4b2   :  { %v1525_v47 = vpop.permute.xlu0 %1524 }
 0x4b3   :  { %v1527_v48 = vmul.f32 %v1525_v47, %v1518_v41 }
 0x4b5   :  { %1529 = vrot.lane.b32.xlu1 %v1527_v48, %s6623_s6 }
 0x527   :  { %v1530_v51 = vpop.permute.xlu1 %1529 }
 0x528   :  { %v6837_v52 = vadd.f32 %v1530_v51, %v1522_v50 }
 0x52a   :  { %6517 = vtanh.f32 %v6837_v52  ;;  %v2042_v15 = vrot.slane %v6837_v52, 7 }
 0x534   :  { %v6518_v53 = vpop.eup %6517 }
 0x535   :  { %1535 = vrot.lane.b32.xlu0 %v6518_v53, %s6622_s1 }
 0x5a7   :  { %v1536_v54 = vpop.permute.xlu0 %1535 }
 0x5a8   :  { %v1538_v55 = vmul.f32 %v1536_v54, %v1518_v41 }
 0x5aa   :  { %v1540_v56 = vrot.slane %v1538_v55, 1 }
 0x5ac   :  { %1541 = vrot.lane.b32.xlu1 %v1540_v56, %s6623_s6 }
 0x61e   :  { %v1542_v57 = vpop.permute.xlu1 %1541 }
 0x61f   :  { %v1543_v58 = vsel %vm506_vm2, %v1542_v57, 0 }
 0x620   :  { %v1614_v59 = vand.u32 4294901760, %v1543_v58 }
 0x622   :  { %v1615_v61 = vsub.f32 %v1543_v58, %v1614_v59 }
 0x624   :  { %v1616_v62 = vand.u32 4294901760, %v1615_v61 }
 0x626   :  { %v1617_v63 = vsub.f32 %v1615_v61, %v1616_v62 }
 0x628   :  { %v1618_v1 = vand.u32 4294901760, %v1617_v63 }
 0x62a   :  { %5633 = vmatmul.mubr.f32.vlgmr.msra.gmra.mrb[6].mxu0 %v1618_v1 }
 0x62b   :  { %6166 = vmatpush3.bf16.msra.mxu0 %v6703_v39  ;;  %5643 = vmatprep.mubr.msk.f32.mxu0 %vm6620_vm0, %v6619_v0 }
 0x62c   :  { %6167 = vmatprep.subr.bf16.mxu0 %v6621_v16 }
 0x62f   :  { %6169 = vmatpush3.bf16.msra.mxu0 %v6709_v42 }
 0x630   :  { %6170 = vmatprep.subr.bf16.mxu0 %v6621_v16 }
 0x632   :  { %5644 = vmatmul.mubr.f32.vlgmr.msra.gmra.mrb[6].mxu0 %v1614_v59 }
 0x633   :  { %6172 = vmatpush3.bf16.msra.mxu0 %v6719_v43  ;;  %5654 = vmatprep.mubr.msk.f32.mxu0 %vm6620_vm0, %v6619_v0 }
 0x634   :  { %6173 = vmatprep.subr.bf16.mxu0 %v6621_v16 }
 0x637   :  { %6175 = vmatpush3.bf16.msra.mxu0 %v6724_v44 }
 0x638   :  { %6176 = vmatprep.subr.bf16.mxu0 %v6621_v16 }
 0x63a   :  { %5655 = vmatmul.mubr.f32.vlgmr.msra.gmra.mrb[6].mxu0 %v1615_v61 }
 0x63b   :  { %6178 = vmatpush3.bf16.msra.mxu0 %v6688_v28  ;;  %5665 = vmatprep.mubr.msk.f32.mxu0 %vm6620_vm0, %v6619_v0 }
 0x63c   :  { %6179 = vmatprep.subr.bf16.mxu0 %v6621_v16 }
 0x63f   :  { %6181 = vmatpush3.bf16.msra.mxu0 %v6693_v34 }
 0x640   :  { %6182 = vmatprep.subr.bf16.mxu0 %v6621_v16 }
 0x642   :  { %5666 = vmatmul.mubr.f32.vlgmr.msra.gmra.mrb[6].mxu0 %v1616_v62 }
 0x643   :  { %6184 = vmatpush3.bf16.msra.mxu0 %v6734_v45  ;;  %5676 = vmatprep.mubr.msk.f32.mxu0 %vm6620_vm0, %v6619_v0 }
 0x644   :  { %6185 = vmatprep.subr.bf16.mxu0 %v6621_v16 }
 0x647   :  { %6187 = vmatpush3.bf16.msra.mxu0 %v6743_v46 }
 0x648   :  { %6188 = vmatprep.subr.bf16.mxu0 %v6621_v16 }
 0x64a   :  { %5677 = vmatmul.mubr.f32.vlgmr.msra.gmra.mrb[6].mxu0 %v1614_v59 }
 0x64b   :  { %6190 = vmatpush3.bf16.msra.mxu0 %v6688_v28  ;;  %5687 = vmatprep.mubr.msk.f32.mxu0 %vm6620_vm0, %v6619_v0 }
 0x64c   :  { %6191 = vmatprep.subr.bf16.mxu0 %v6621_v16 }
 0x64f   :  { %6193 = vmatpush3.bf16.msra.mxu0 %v6693_v34 }
 0x650   :  { %6230 = vmatprep.subr.bf16.mxu0 %v6621_v16 }
 0x652   :  { %5688 = vmatmul.mubr.f32.vlgmr.msra.gmra.mrb[6].mxu0 %v1614_v59 }
 0x653   :  { %6232 = vmatpush3.bf16.msra.mxu0 %v6688_v28  ;;  %5764 = vmatprep.mubr.msk.f32.mxu0 %vm6620_vm0, %v6619_v0 }
 0x654   :  { %6233 = vmatprep.subr.bf16.mxu0 %v6621_v16 }
 0x657   :  { %6235 = vmatpush3.bf16.msra.mxu0 %v6693_v34 }
 0x658   :  { %6236 = vmatprep.subr.bf16.mxu0 %v6621_v16 }
 0x725   :  { %v2026_v2 = vpop.f32.mrb[6].mxu0 }
 0x726   :  { %v2031_v3 = vrot.slane %v2026_v2, 6  ;;  %v5689_v4 = vpop.f32.mrb[7].mxu0 }
 0x728   :  { %v2033_v5 = vadd.f32 %v6778_v60, %v2031_v3 }
 0x72a   :  { %6519 = vtanh.f32 %v2033_v5 }
 0x734   :  { %v6520_v8 = vpop.eup %6519 }
 0x735   :  { %v2037_v10 = vmul.f32 %v6520_v8, %v2035_v6  ;;  %v3082_v8 = vrot.slane %v6783_v11, 4 }
 0x737   :  { %v2040_v12 = vadd.f32 %v2038_v7, %v2037_v10  ;;  %v3079_v7 = vrot.slane %v6781_v9, 4 }
 0x739   :  { %2046 = vrot.lane.b32.xlu0 %v2040_v12, %s6622_s1  ;;  %v2044_v17 = vmul.f32 %v2042_v15, %v2040_v12 }
 0x7ab   :  { %v2047_v13 = vpop.permute.xlu0 %2046 }
 0x7ac   :  { %v2049_v14 = vmul.f32 %v2047_v13, %v2040_v12 }
 0x7ae   :  { %2051 = vrot.lane.b32.xlu1 %v2049_v14, %s6623_s6 }
 0x820   :  { %v2052_v18 = vpop.permute.xlu1 %2051 }
 0x821   :  { %v6885_v19 = vadd.f32 %v2052_v18, %v2044_v17 }
 0x823   :  { %6521 = vtanh.f32 %v6885_v19  ;;  %v2564_v50 = vrot.slane %v6885_v19, 7 }
 0x82d   :  { %v6522_v20 = vpop.eup %6521 }
 0x82e   :  { %2057 = vrot.lane.b32.xlu0 %v6522_v20, %s6622_s1 }
 0x8a0   :  { %v2058_v21 = vpop.permute.xlu0 %2057 }
 0x8a1   :  { %v2060_v22 = vmul.f32 %v2058_v21, %v2040_v12 }
 0x8a3   :  { %v2062_v23 = vrot.slane %v2060_v22, 2 }
 0x8a5   :  { %2063 = vrot.lane.b32.xlu1 %v2062_v23, %s6623_s6 }
 0x917   :  { %v2064_v24 = vpop.permute.xlu1 %2063 }
 0x918   :  { %v2065_v25 = vsel %vm506_vm2, %v2064_v24, 0 }
 0x919   :  { %v2136_v26 = vand.u32 4294901760, %v2065_v25 }
 0x91b   :  { %v2137_v27 = vsub.f32 %v2065_v25, %v2136_v26 }
 0x91d   :  { %v2138_v29 = vand.u32 4294901760, %v2137_v27 }
 0x91f   :  { %v2139_v30 = vsub.f32 %v2137_v27, %v2138_v29 }
 0x921   :  { %v2140_v31 = vand.u32 4294901760, %v2139_v30 }
 0x923   :  { %5699 = vmatmul.mubr.f32.vlgmr.msra.gmra.mrb[12].mxu1 %v2140_v31 }
 0x924   :  { %6202 = vmatpush3.bf16.msra.mxu1 %v6703_v39  ;;  %5709 = vmatprep.mubr.msk.f32.mxu1 %vm6620_vm0, %v6619_v0 }
 0x925   :  { %6203 = vmatprep.subr.bf16.mxu1 %v6621_v16 }
 0x928   :  { %6205 = vmatpush3.bf16.msra.mxu1 %v6709_v42 }
 0x929   :  { %6206 = vmatprep.subr.bf16.mxu1 %v6621_v16 }
 0x92b   :  { %5710 = vmatmul.mubr.f32.vlgmr.msra.gmra.mrb[12].mxu1 %v2136_v26 }
 0x92c   :  { %6208 = vmatpush3.bf16.msra.mxu1 %v6719_v43  ;;  %5720 = vmatprep.mubr.msk.f32.mxu1 %vm6620_vm0, %v6619_v0 }
 0x92d   :  { %6209 = vmatprep.subr.bf16.mxu1 %v6621_v16 }
 0x930   :  { %6211 = vmatpush3.bf16.msra.mxu1 %v6724_v44 }
 0x931   :  { %6212 = vmatprep.subr.bf16.mxu1 %v6621_v16 }
 0x933   :  { %5721 = vmatmul.mubr.f32.vlgmr.msra.gmra.mrb[12].mxu1 %v2137_v27 }
 0x934   :  { %6214 = vmatpush3.bf16.msra.mxu1 %v6688_v28  ;;  %5731 = vmatprep.mubr.msk.f32.mxu1 %vm6620_vm0, %v6619_v0 }
 0x935   :  { %6215 = vmatprep.subr.bf16.mxu1 %v6621_v16 }
 0x938   :  { %6217 = vmatpush3.bf16.msra.mxu1 %v6693_v34 }
 0x939   :  { %6218 = vmatprep.subr.bf16.mxu1 %v6621_v16 }
 0x93b   :  { %5732 = vmatmul.mubr.f32.vlgmr.msra.gmra.mrb[12].mxu1 %v2138_v29 }
 0x93c   :  { %6220 = vmatpush3.bf16.msra.mxu1 %v6734_v45  ;;  %5742 = vmatprep.mubr.msk.f32.mxu1 %vm6620_vm0, %v6619_v0 }
 0x93d   :  { %6221 = vmatprep.subr.bf16.mxu1 %v6621_v16 }
 0x940   :  { %6223 = vmatpush3.bf16.msra.mxu1 %v6743_v46 }
 0x941   :  { %6224 = vmatprep.subr.bf16.mxu1 %v6621_v16 }
 0x943   :  { %5743 = vmatmul.mubr.f32.vlgmr.msra.gmra.mrb[12].mxu1 %v2136_v26 }
 0x944   :  { %6226 = vmatpush3.bf16.msra.mxu1 %v6688_v28  ;;  %5753 = vmatprep.mubr.msk.f32.mxu1 %vm6620_vm0, %v6619_v0 }
 0x945   :  { %6227 = vmatprep.subr.bf16.mxu1 %v6621_v16 }
 0x948   :  { %6229 = vmatpush3.bf16.msra.mxu1 %v6693_v34 }
 0x949   :  { %6266 = vmatprep.subr.bf16.mxu1 %v6621_v16 }
 0x94b   :  { %5754 = vmatmul.mubr.f32.vlgmr.msra.gmra.mrb[12].mxu1 %v2136_v26 }
 0x94c   :  { %6268 = vmatpush3.bf16.msra.mxu1 %v6688_v28  ;;  %5830 = vmatprep.mubr.msk.f32.mxu1 %vm6620_vm0, %v6619_v0 }
 0x94d   :  { %6269 = vmatprep.subr.bf16.mxu1 %v6621_v16 }
 0x950   :  { %6271 = vmatpush3.bf16.msra.mxu1 %v6693_v34 }
 0x951   :  { %6272 = vmatprep.subr.bf16.mxu1 %v6621_v16 }
 0xa1e   :  { %v2548_v32 = vpop.f32.mrb[12].mxu1 }
 0xa1f   :  { %v2553_v33 = vrot.slane %v2548_v32, 5  ;;  %v5755_v35 = vpop.f32.mrb[13].mxu1 }
 0xa21   :  { %v2555_v36 = vadd.f32 %v6778_v60, %v2553_v33 }
 0xa23   :  { %6523 = vtanh.f32 %v2555_v36 }
 0xa2d   :  { %v6524_v40 = vpop.eup %6523 }
 0xa2e   :  { %v2559_v41 = vmul.f32 %v6524_v40, %v2557_v37  ;;  %v3604_v40 = vrot.slane %v6783_v11, 3 }
 0xa30   :  { %v2562_v47 = vadd.f32 %v2560_v38, %v2559_v41  ;;  %v3601_v38 = vrot.slane %v6781_v9, 3 }
 0xa32   :  { %2568 = vrot.lane.b32.xlu0 %v2562_v47, %s6622_s1  ;;  %v2566_v51 = vmul.f32 %v2564_v50, %v2562_v47 }
 0xaa4   :  { %v2569_v48 = vpop.permute.xlu0 %2568 }
 0xaa5   :  { %v2571_v49 = vmul.f32 %v2569_v48, %v2562_v47 }
 0xaa7   :  { %2573 = vrot.lane.b32.xlu1 %v2571_v49, %s6623_s6 }
 0xb19   :  { %v2574_v52 = vpop.permute.xlu1 %2573 }
 0xb1a   :  { %v6933_v53 = vadd.f32 %v2574_v52, %v2566_v51 }
 0xb1c   :  { %6525 = vtanh.f32 %v6933_v53  ;;  %v3086_v17 = vrot.slane %v6933_v53, 7 }
 0xb26   :  { %v6526_v54 = vpop.eup %6525 }
 0xb27   :  { %2579 = vrot.lane.b32.xlu0 %v6526_v54, %s6622_s1 }
 0xb99   :  { %v2580_v55 = vpop.permute.xlu0 %2579 }
 0xb9a   :  { %v2582_v56 = vmul.f32 %v2580_v55, %v2562_v47 }
 0xb9c   :  { %v2584_v57 = vrot.slane %v2582_v56, 3 }
 0xb9e   :  { %2585 = vrot.lane.b32.xlu1 %v2584_v57, %s6623_s6 }
 0xc10   :  { %v2586_v58 = vpop.permute.xlu1 %2585 }
 0xc11   :  { %v2587_v59 = vsel %vm506_vm2, %v2586_v58, 0 }
 0xc12   :  { %v2658_v61 = vand.u32 4294901760, %v2587_v59 }
 0xc14   :  { %v2659_v62 = vsub.f32 %v2587_v59, %v2658_v61 }
 0xc16   :  { %v2660_v63 = vand.u32 4294901760, %v2659_v62 }
 0xc18   :  { %v2661_v1 = vsub.f32 %v2659_v62, %v2660_v63 }
 0xc1a   :  { %v2662_v2 = vand.u32 4294901760, %v2661_v1 }
 0xc1c   :  { %5765 = vmatmul.mubr.f32.vlgmr.msra.gmra.mrb[8].mxu0 %v2662_v2 }
 0xc1d   :  { %6238 = vmatpush3.bf16.msra.mxu0 %v6703_v39  ;;  %5775 = vmatprep.mubr.msk.f32.mxu0 %vm6620_vm0, %v6619_v0 }
 0xc1e   :  { %6239 = vmatprep.subr.bf16.mxu0 %v6621_v16 }
 0xc21   :  { %6241 = vmatpush3.bf16.msra.mxu0 %v6709_v42 }
 0xc22   :  { %6242 = vmatprep.subr.bf16.mxu0 %v6621_v16 }
 0xc24   :  { %5776 = vmatmul.mubr.f32.vlgmr.msra.gmra.mrb[8].mxu0 %v2658_v61 }
 0xc25   :  { %6244 = vmatpush3.bf16.msra.mxu0 %v6719_v43  ;;  %5786 = vmatprep.mubr.msk.f32.mxu0 %vm6620_vm0, %v6619_v0 }
 0xc26   :  { %6245 = vmatprep.subr.bf16.mxu0 %v6621_v16 }
 0xc29   :  { %6247 = vmatpush3.bf16.msra.mxu0 %v6724_v44 }
 0xc2a   :  { %6248 = vmatprep.subr.bf16.mxu0 %v6621_v16 }
 0xc2c   :  { %5787 = vmatmul.mubr.f32.vlgmr.msra.gmra.mrb[8].mxu0 %v2659_v62 }
 0xc2d   :  { %6250 = vmatpush3.bf16.msra.mxu0 %v6688_v28  ;;  %5797 = vmatprep.mubr.msk.f32.mxu0 %vm6620_vm0, %v6619_v0 }
 0xc2e   :  { %6251 = vmatprep.subr.bf16.mxu0 %v6621_v16 }
 0xc31   :  { %6253 = vmatpush3.bf16.msra.mxu0 %v6693_v34 }
 0xc32   :  { %6254 = vmatprep.subr.bf16.mxu0 %v6621_v16 }
 0xc34   :  { %5798 = vmatmul.mubr.f32.vlgmr.msra.gmra.mrb[8].mxu0 %v2660_v63 }
 0xc35   :  { %6256 = vmatpush3.bf16.msra.mxu0 %v6734_v45  ;;  %5808 = vmatprep.mubr.msk.f32.mxu0 %vm6620_vm0, %v6619_v0 }
 0xc36   :  { %6257 = vmatprep.subr.bf16.mxu0 %v6621_v16 }
 0xc39   :  { %6259 = vmatpush3.bf16.msra.mxu0 %v6743_v46 }
 0xc3a   :  { %6260 = vmatprep.subr.bf16.mxu0 %v6621_v16 }
 0xc3c   :  { %5809 = vmatmul.mubr.f32.vlgmr.msra.gmra.mrb[8].mxu0 %v2658_v61 }
 0xc3d   :  { %6262 = vmatpush3.bf16.msra.mxu0 %v6688_v28  ;;  %5819 = vmatprep.mubr.msk.f32.mxu0 %vm6620_vm0, %v6619_v0 }
 0xc3e   :  { %6263 = vmatprep.subr.bf16.mxu0 %v6621_v16 }
 0xc41   :  { %6265 = vmatpush3.bf16.msra.mxu0 %v6693_v34 }
 0xc42   :  { %6302 = vmatprep.subr.bf16.mxu0 %v6621_v16 }
 0xc44   :  { %5820 = vmatmul.mubr.f32.vlgmr.msra.gmra.mrb[8].mxu0 %v2658_v61 }
 0xc45   :  { %6304 = vmatpush3.bf16.msra.mxu0 %v6688_v28  ;;  %5896 = vmatprep.mubr.msk.f32.mxu0 %vm6620_vm0, %v6619_v0 }
 0xc46   :  { %6305 = vmatprep.subr.bf16.mxu0 %v6621_v16 }
 0xc49   :  { %6307 = vmatpush3.bf16.msra.mxu0 %v6693_v34 }
 0xc4a   :  { %6308 = vmatprep.subr.bf16.mxu0 %v6621_v16 }
 0xd17   :  { %v3070_v3 = vpop.f32.mrb[8].mxu0 }
 0xd18   :  { %v3075_v4 = vrot.slane %v3070_v3, 4  ;;  %v5821_v5 = vpop.f32.mrb[9].mxu0 }
 0xd1a   :  { %v3077_v6 = vadd.f32 %v6778_v60, %v3075_v4 }
 0xd1c   :  { %6527 = vtanh.f32 %v3077_v6 }
 0xd26   :  { %v6528_v10 = vpop.eup %6527 }
 0xd27   :  { %v3081_v12 = vmul.f32 %v6528_v10, %v3079_v7  ;;  %v4126_v10 = vrot.slane %v6783_v11, 2 }
 0xd29   :  { %v3084_v13 = vadd.f32 %v3082_v8, %v3081_v12  ;;  %v4123_v8 = vrot.slane %v6781_v9, 2 }
 0xd2b   :  { %3090 = vrot.lane.b32.xlu0 %v3084_v13, %s6622_s1  ;;  %v3088_v18 = vmul.f32 %v3086_v17, %v3084_v13 }
 0xd9d   :  { %v3091_v14 = vpop.permute.xlu0 %3090 }
 0xd9e   :  { %v3093_v15 = vmul.f32 %v3091_v14, %v3084_v13 }
 0xda0   :  { %3095 = vrot.lane.b32.xlu1 %v3093_v15, %s6623_s6 }
 0xe12   :  { %v3096_v19 = vpop.permute.xlu1 %3095 }
 0xe13   :  { %v6981_v20 = vadd.f32 %v3096_v19, %v3088_v18 }
 0xe15   :  { %6529 = vtanh.f32 %v6981_v20  ;;  %v3608_v51 = vrot.slane %v6981_v20, 7 }
 0xe1f   :  { %v6530_v21 = vpop.eup %6529 }
 0xe20   :  { %3101 = vrot.lane.b32.xlu0 %v6530_v21, %s6622_s1 }
 0xe92   :  { %v3102_v22 = vpop.permute.xlu0 %3101 }
 0xe93   :  { %v3104_v23 = vmul.f32 %v3102_v22, %v3084_v13 }
 0xe95   :  { %v3106_v24 = vrot.slane %v3104_v23, 4 }
 0xe97   :  { %3107 = vrot.lane.b32.xlu1 %v3106_v24, %s6623_s6 }
 0xf09   :  { %v3108_v25 = vpop.permute.xlu1 %3107 }
 0xf0a   :  { %v3109_v26 = vsel %vm506_vm2, %v3108_v25, 0 }
 0xf0b   :  { %v3180_v27 = vand.u32 4294901760, %v3109_v26 }
 0xf0d   :  { %v3181_v29 = vsub.f32 %v3109_v26, %v3180_v27 }
 0xf0f   :  { %v3182_v30 = vand.u32 4294901760, %v3181_v29 }
 0xf11   :  { %v3183_v31 = vsub.f32 %v3181_v29, %v3182_v30 }
 0xf13   :  { %v3184_v32 = vand.u32 4294901760, %v3183_v31 }
 0xf15   :  { %5831 = vmatmul.mubr.f32.vlgmr.msra.gmra.mrb[14].mxu1 %v3184_v32 }
 0xf16   :  { %6274 = vmatpush3.bf16.msra.mxu1 %v6703_v39  ;;  %5841 = vmatprep.mubr.msk.f32.mxu1 %vm6620_vm0, %v6619_v0 }
 0xf17   :  { %6275 = vmatprep.subr.bf16.mxu1 %v6621_v16 }
 0xf1a   :  { %6277 = vmatpush3.bf16.msra.mxu1 %v6709_v42 }
 0xf1b   :  { %6278 = vmatprep.subr.bf16.mxu1 %v6621_v16 }
 0xf1d   :  { %5842 = vmatmul.mubr.f32.vlgmr.msra.gmra.mrb[14].mxu1 %v3180_v27 }
 0xf1e   :  { %6280 = vmatpush3.bf16.msra.mxu1 %v6719_v43  ;;  %5852 = vmatprep.mubr.msk.f32.mxu1 %vm6620_vm0, %v6619_v0 }
 0xf1f   :  { %6281 = vmatprep.subr.bf16.mxu1 %v6621_v16 }
 0xf22   :  { %6283 = vmatpush3.bf16.msra.mxu1 %v6724_v44 }
 0xf23   :  { %6284 = vmatprep.subr.bf16.mxu1 %v6621_v16 }
 0xf25   :  { %5853 = vmatmul.mubr.f32.vlgmr.msra.gmra.mrb[14].mxu1 %v3181_v29 }
 0xf26   :  { %6286 = vmatpush3.bf16.msra.mxu1 %v6688_v28  ;;  %5863 = vmatprep.mubr.msk.f32.mxu1 %vm6620_vm0, %v6619_v0 }
 0xf27   :  { %6287 = vmatprep.subr.bf16.mxu1 %v6621_v16 }
 0xf2a   :  { %6289 = vmatpush3.bf16.msra.mxu1 %v6693_v34 }
 0xf2b   :  { %6290 = vmatprep.subr.bf16.mxu1 %v6621_v16 }
 0xf2d   :  { %5864 = vmatmul.mubr.f32.vlgmr.msra.gmra.mrb[14].mxu1 %v3182_v30 }
 0xf2e   :  { %6292 = vmatpush3.bf16.msra.mxu1 %v6734_v45  ;;  %5874 = vmatprep.mubr.msk.f32.mxu1 %vm6620_vm0, %v6619_v0 }
 0xf2f   :  { %6293 = vmatprep.subr.bf16.mxu1 %v6621_v16 }
 0xf32   :  { %6295 = vmatpush3.bf16.msra.mxu1 %v6743_v46 }
 0xf33   :  { %6296 = vmatprep.subr.bf16.mxu1 %v6621_v16 }
 0xf35   :  { %5875 = vmatmul.mubr.f32.vlgmr.msra.gmra.mrb[14].mxu1 %v3180_v27 }
 0xf36   :  { %6298 = vmatpush3.bf16.msra.mxu1 %v6688_v28  ;;  %5885 = vmatprep.mubr.msk.f32.mxu1 %vm6620_vm0, %v6619_v0 }
 0xf37   :  { %6299 = vmatprep.subr.bf16.mxu1 %v6621_v16 }
 0xf3a   :  { %6301 = vmatpush3.bf16.msra.mxu1 %v6693_v34 }
 0xf3b   :  { %6338 = vmatprep.subr.bf16.mxu1 %v6621_v16 }
 0xf3d   :  { %5886 = vmatmul.mubr.f32.vlgmr.msra.gmra.mrb[14].mxu1 %v3180_v27 }
 0xf3e   :  { %6340 = vmatpush3.bf16.msra.mxu1 %v6688_v28  ;;  %5962 = vmatprep.mubr.msk.f32.mxu1 %vm6620_vm0, %v6619_v0 }
 0xf3f   :  { %6341 = vmatprep.subr.bf16.mxu1 %v6621_v16 }
 0xf42   :  { %6343 = vmatpush3.bf16.msra.mxu1 %v6693_v34 }
 0xf43   :  { %6344 = vmatprep.subr.bf16.mxu1 %v6621_v16 }
0x1010   :  { %v3592_v33 = vpop.f32.mrb[14].mxu1 }
0x1011   :  { %v3597_v35 = vrot.slane %v3592_v33, 3  ;;  %v5887_v36 = vpop.f32.mrb[15].mxu1 }
0x1013   :  { %v3599_v37 = vadd.f32 %v6778_v60, %v3597_v35 }
0x1015   :  { %6531 = vtanh.f32 %v3599_v37 }
0x101f   :  { %v6532_v41 = vpop.eup %6531 }
0x1020   :  { %v3603_v47 = vmul.f32 %v6532_v41, %v3601_v38 }
0x1022   :  { %v3606_v48 = vadd.f32 %v3604_v40, %v3603_v47 }
0x1024   :  { %3612 = vrot.lane.b32.xlu0 %v3606_v48, %s6622_s1  ;;  %v3610_v52 = vmul.f32 %v3608_v51, %v3606_v48 }
0x1096   :  { %v3613_v49 = vpop.permute.xlu0 %3612 }
0x1097   :  { %v3615_v50 = vmul.f32 %v3613_v49, %v3606_v48 }
0x1099   :  { %3617 = vrot.lane.b32.xlu1 %v3615_v50, %s6623_s6 }
0x110b   :  { %v3618_v53 = vpop.permute.xlu1 %3617 }
0x110c   :  { %v7029_v54 = vadd.f32 %v3618_v53, %v3610_v52  ;;  %v46_v53 = vld [vmem:[#allocation5 + $0x39] sm:$0xff] }
0x110e   :  { %6533 = vtanh.f32 %v7029_v54  ;;  %v4130_v18 = vrot.slane %v7029_v54, 7  ;;  %v47_v54 = vld [vmem:[#allocation5 + $0x41] sm:$0xff] }
0x1118   :  { %v6534_v55 = vpop.eup %6533 }
0x1119   :  { %3623 = vrot.lane.b32.xlu0 %v6534_v55, %s6622_s1  ;;  %v4684_v55 = vand.u32 4294901760, %v46_v53 }
0x118b   :  { %v3624_v56 = vpop.permute.xlu0 %3623 }
0x118c   :  { %v3626_v57 = vmul.f32 %v3624_v56, %v3606_v48  ;;  %v45_v48 = vld [vmem:[#allocation5 + $0x31] sm:$0xff]  ;;  %v4687_v56 = vand.u32 4294901760, %v47_v54 }
0x118d   :  { %v4681_v49 = vand.u32 4294901760, %v45_v48 }
0x118e   :  { %v3628_v58 = vrot.slane %v3626_v57, 5 }
0x118f   :  { %v4765_v52 = vsub.f32 %v45_v48, %v4681_v49 }
0x1190   :  { %3629 = vrot.lane.b32.xlu1 %v3628_v58, %s6623_s6 }
0x1191   :  { %v4766_v58 = vand.u32 4294901760, %v4765_v52 }
0x1202   :  { %v3630_v59 = vpop.permute.xlu1 %3629 }
0x1203   :  { %v3631_v61 = vsel %vm506_vm2, %v3630_v59, 0  ;;  %v6378_v59 = vpack.c.bf16 %v4687_v56, %v4684_v55 }
0x1204   :  { %v3702_v62 = vand.u32 4294901760, %v3631_v61 }
0x1206   :  { %v3703_v63 = vsub.f32 %v3631_v61, %v3702_v62  ;;  %v4772_v61 = vsub.f32 %v46_v53, %v4684_v55 }
0x1208   :  { %v3704_v1 = vand.u32 4294901760, %v3703_v63 }
0x120a   :  { %v3705_v2 = vsub.f32 %v3703_v63, %v3704_v1 }
0x120c   :  { %v3706_v3 = vand.u32 4294901760, %v3705_v2 }
0x120e   :  { %5897 = vmatmul.mubr.f32.vlgmr.msra.gmra.mrb[10].mxu0 %v3706_v3 }
0x120f   :  { %6310 = vmatpush3.bf16.msra.mxu0 %v6703_v39  ;;  %5907 = vmatprep.mubr.msk.f32.mxu0 %vm6620_vm0, %v6619_v0 }
0x1210   :  { %6311 = vmatprep.subr.bf16.mxu0 %v6621_v16 }
0x1213   :  { %6313 = vmatpush3.bf16.msra.mxu0 %v6709_v42 }
0x1214   :  { %6314 = vmatprep.subr.bf16.mxu0 %v6621_v16 }
0x1216   :  { %5908 = vmatmul.mubr.f32.vlgmr.msra.gmra.mrb[10].mxu0 %v3702_v62 }
0x1217   :  { %6316 = vmatpush3.bf16.msra.mxu0 %v6719_v43  ;;  %5918 = vmatprep.mubr.msk.f32.mxu0 %vm6620_vm0, %v6619_v0 }
0x1218   :  { %6317 = vmatprep.subr.bf16.mxu0 %v6621_v16 }
0x121b   :  { %6319 = vmatpush3.bf16.msra.mxu0 %v6724_v44 }
0x121c   :  { %6320 = vmatprep.subr.bf16.mxu0 %v6621_v16 }
0x121e   :  { %5919 = vmatmul.mubr.f32.vlgmr.msra.gmra.mrb[10].mxu0 %v3703_v63 }
0x121f   :  { %6322 = vmatpush3.bf16.msra.mxu0 %v6688_v28  ;;  %5929 = vmatprep.mubr.msk.f32.mxu0 %vm6620_vm0, %v6619_v0 }
0x1220   :  { %6323 = vmatprep.subr.bf16.mxu0 %v6621_v16 }
0x1223   :  { %6325 = vmatpush3.bf16.msra.mxu0 %v6693_v34 }
0x1224   :  { %6326 = vmatprep.subr.bf16.mxu0 %v6621_v16 }
0x1226   :  { %5930 = vmatmul.mubr.f32.vlgmr.msra.gmra.mrb[10].mxu0 %v3704_v1  ;;  %v4767_v1 = vsub.f32 %v4765_v52, %v4766_v58 }
0x1227   :  { %6328 = vmatpush3.bf16.msra.mxu0 %v6734_v45  ;;  %5940 = vmatprep.mubr.msk.f32.mxu0 %vm6620_vm0, %v6619_v0 }
0x1228   :  { %6329 = vmatprep.subr.bf16.mxu0 %v6621_v16 }
0x122b   :  { %6331 = vmatpush3.bf16.msra.mxu0 %v6743_v46 }
0x122c   :  { %6332 = vmatprep.subr.bf16.mxu0 %v6621_v16 }
0x122e   :  { %5941 = vmatmul.mubr.f32.vlgmr.msra.gmra.mrb[10].mxu0 %v3702_v62 }
0x122f   :  { %6334 = vmatpush3.bf16.msra.mxu0 %v6688_v28  ;;  %5951 = vmatprep.mubr.msk.f32.mxu0 %vm6620_vm0, %v6619_v0 }
0x1230   :  { %6335 = vmatprep.subr.bf16.mxu0 %v6621_v16 }
0x1233   :  { %6337 = vmatpush3.bf16.msra.mxu0 %v6693_v34 }
0x1234   :  { %6374 = vmatprep.subr.bf16.mxu0 %v6621_v16 }
0x1236   :  { %5952 = vmatmul.mubr.f32.vlgmr.msra.gmra.mrb[10].mxu0 %v3702_v62  ;;  %v4779_v62 = vsub.f32 %v47_v54, %v4687_v56 }
0x1237   :  { %6028 = vmatprep.mubr.msk.f32.mxu0 %vm6620_vm0, %v6619_v0 }
0x1309   :  { %v4114_v4 = vpop.f32.mrb[10].mxu0 }
0x130a   :  { %v4119_v5 = vrot.slane %v4114_v4, 2  ;;  %v5953_v6 = vpop.f32.mrb[11].mxu0  ;;  %v4773_v4 = vand.u32 4294901760, %v4772_v61 }
0x130c   :  { %v4121_v7 = vadd.f32 %v6778_v60, %v4119_v5  ;;  %v4780_v5 = vand.u32 4294901760, %v4779_v62 }
0x130e   :  { %6535 = vtanh.f32 %v4121_v7  ;;  %v4768_v7 = vand.u32 4294901760, %v4767_v1 }
0x1318   :  { %v6536_v12 = vpop.eup %6535 }
0x1319   :  { %v4125_v13 = vmul.f32 %v6536_v12, %v4123_v8  ;;  %v4774_v8 = vsub.f32 %v4772_v61, %v4773_v4 }
0x131b   :  { %v4128_v14 = vadd.f32 %v4126_v10, %v4125_v13  ;;  %v4781_v10 = vsub.f32 %v4779_v62, %v4780_v5 }
0x131d   :  { %4134 = vrot.lane.b32.xlu0 %v4128_v14, %s6622_s1  ;;  %v4132_v19 = vmul.f32 %v4130_v18, %v4128_v14 }
0x138f   :  { %v4135_v15 = vpop.permute.xlu0 %4134 }
0x1390   :  { %v4137_v17 = vmul.f32 %v4135_v15, %v4128_v14  ;;  %v4782_v15 = vand.u32 4294901760, %v4781_v10 }
0x1392   :  { %4139 = vrot.lane.b32.xlu1 %v4137_v17, %s6623_s6 }
0x1404   :  { %v4140_v20 = vpop.permute.xlu1 %4139 }
0x1405   :  { %v4142_v21 = vadd.f32 %v4140_v20, %v4132_v19  ;;  %v6390_v19 = vpack.c.bf16 %v4779_v62, %v4772_v61 }
0x1407   :  { %6537 = vtanh.f32 %v4142_v21 }
0x1411   :  { %v6538_v22 = vpop.eup %6537 }
0x1412   :  { %4145 = vrot.lane.b32.xlu0 %v6538_v22, %s6622_s1 }
0x1484   :  { %v4146_v23 = vpop.permute.xlu0 %4145 }
0x1485   :  { %v4148_v24 = vmul.f32 %v4146_v23, %v4128_v14  ;;  %v4775_v14 = vand.u32 4294901760, %v4774_v8 }
0x1487   :  { %v4150_v25 = vrot.slane %v4148_v24, 6  ;;  %v6384_v17 = vpack.c.bf16 %v4782_v15, %v4775_v14 }
0x1489   :  { %4151 = vrot.lane.b32.xlu1 %v4150_v25, %s6623_s6 }
0x14fb   :  { %v4152_v26 = vpop.permute.xlu1 %4151 }
0x14fc   :  { %v4153_v27 = vsel %vm506_vm2, %v4152_v26, 0 }
0x14fd   :  { %v4224_v29 = vand.u32 4294901760, %v4153_v27 }
0x14ff   :  { %v4225_v30 = vsub.f32 %v4153_v27, %v4224_v29 }
0x1501   :  { %v4226_v31 = vand.u32 4294901760, %v4225_v30 }
0x1503   :  { %v4227_v32 = vsub.f32 %v4225_v30, %v4226_v31 }
0x1505   :  { %v4228_v33 = vand.u32 4294901760, %v4227_v32 }
0x1507   :  { %5963 = vmatmul.mubr.f32.vlgmr.msra.gmra.mrb[16].mxu1 %v4228_v33 }
0x1508   :  { %6346 = vmatpush3.bf16.msra.mxu1 %v6703_v39  ;;  %5973 = vmatprep.mubr.msk.f32.mxu1 %vm6620_vm0, %v6619_v0 }
0x1509   :  { %6347 = vmatprep.subr.bf16.mxu1 %v6621_v16 }
0x150c   :  { %6349 = vmatpush3.bf16.msra.mxu1 %v6709_v42 }
0x150d   :  { %6350 = vmatprep.subr.bf16.mxu1 %v6621_v16 }
0x150f   :  { %5974 = vmatmul.mubr.f32.vlgmr.msra.gmra.mrb[16].mxu1 %v4224_v29 }
0x1510   :  { %6352 = vmatpush3.bf16.msra.mxu1 %v6719_v43  ;;  %5984 = vmatprep.mubr.msk.f32.mxu1 %vm6620_vm0, %v6619_v0 }
0x1511   :  { %6353 = vmatprep.subr.bf16.mxu1 %v6621_v16 }
0x1514   :  { %6355 = vmatpush3.bf16.msra.mxu1 %v6724_v44 }
0x1515   :  { %6356 = vmatprep.subr.bf16.mxu1 %v6621_v16 }
0x1517   :  { %5985 = vmatmul.mubr.f32.vlgmr.msra.gmra.mrb[16].mxu1 %v4225_v30  ;;  %v48_v30 = vld [vmem:[#allocation5 + $0x49] sm:$0x1] }
0x1518   :  { %6358 = vmatpush3.bf16.msra.mxu1 %v6688_v28  ;;  %5995 = vmatprep.mubr.msk.f32.mxu1 %vm6620_vm0, %v6619_v0 }
0x1519   :  { %6359 = vmatprep.subr.bf16.mxu1 %v6621_v16 }
0x151c   :  { %6361 = vmatpush3.bf16.msra.mxu1 %v6693_v34 }
0x151d   :  { %6362 = vmatprep.subr.bf16.mxu1 %v6621_v16 }
0x151f   :  { %5996 = vmatmul.mubr.f32.vlgmr.msra.gmra.mrb[16].mxu1 %v4226_v31 }
0x1520   :  { %6364 = vmatpush3.bf16.msra.mxu1 %v6734_v45  ;;  %6006 = vmatprep.mubr.msk.f32.mxu1 %vm6620_vm0, %v6619_v0  ;;  %v4645_v45 = vrot.slane %v6781_v9, 1  ;;  %v44_v9 = vld [vmem:[#allocation5 + $0x29] sm:$0xff] }
0x1521   :  { %6365 = vmatprep.subr.bf16.mxu1 %v6621_v16 }
0x1524   :  { %6367 = vmatpush3.bf16.msra.mxu1 %v6743_v46  ;;  %v4648_v46 = vrot.slane %v6783_v11, 1  ;;  %v4678_v11 = vand.u32 4294901760, %v44_v9 }
0x1525   :  { %6368 = vmatprep.subr.bf16.mxu1 %v6621_v16 }
0x1526   :  { %v7111_v50 = vpack.c.bf16 %v4681_v49, %v4678_v11  ;;  %v4758_v51 = vsub.f32 %v44_v9, %v4678_v11 }
0x1527   :  { %6007 = vmatmul.mubr.f32.vlgmr.msra.gmra.mrb[16].mxu1 %v4224_v29 }
0x1528   :  { %6370 = vmatpush3.bf16.msra.mxu1 %v6688_v28  ;;  %6017 = vmatprep.mubr.msk.f32.mxu1 %vm6620_vm0, %v6619_v0  ;;  %v4759_v57 = vand.u32 4294901760, %v4758_v51  ;;  %v6387_v18 = vpack.c.bf16 %v4765_v52, %v4758_v51 }
0x1529   :  { %6371 = vmatprep.subr.bf16.mxu1 %v6621_v16  ;;  %6376 = vmatpush3.bf16.msra.mxu0 %v7111_v50 }
0x152a   :  { %6377 = vmatprep.subr.bf16.mxu0 %v6621_v16  ;;  %v4760_v63 = vsub.f32 %v4758_v51, %v4759_v57  ;;  %v6399_v20 = vpack.c.bf16 %v4766_v58, %v4759_v57 }
0x152c   :  { %6373 = vmatpush3.bf16.msra.mxu1 %v6693_v34  ;;  %v4652_v34 = vrot.slane %v4142_v21, 7  ;;  %v4761_v3 = vand.u32 4294901760, %v4760_v63  ;;  %v6402_v21 = vpack.c.bf16 %v4780_v5, %v4773_v4 }
0x152d   :  { %6379 = vmatpush3.bf16.msra.mxu0 %v6378_v59 }
0x152e   :  { %6380 = vmatprep.subr.bf16.mxu0 %v6621_v16  ;;  %v6381_v13 = vpack.c.bf16 %v4768_v7, %v4761_v3 }
0x152f   :  { %6018 = vmatmul.mubr.f32.vlgmr.msra.gmra.mrb[16].mxu1 %v4224_v29 }
0x1602   :  { %v4636_v39 = vpop.f32.mrb[16].mxu1 }
0x1603   :  { %v4641_v42 = vrot.slane %v4636_v39, 1  ;;  %v6019_v43 = vpop.f32.mrb[17].mxu1 }
0x1605   :  { %v4643_v44 = vadd.f32 %v6778_v60, %v4641_v42 }
0x1607   :  { %6539 = vtanh.f32 %v4643_v44 }
0x1611   :  { %v6540_v35 = vpop.eup %6539 }
0x1612   :  { %v4647_v28 = vmul.f32 %v6540_v35, %v4645_v45 }
0x1614   :  { %v4650_v36 = vadd.f32 %v4648_v46, %v4647_v28 }
0x1616   :  { %4656 = vrot.lane.b32.xlu0 %v4650_v36, %s6622_s1  ;;  %v4654_v40 = vmul.f32 %v4652_v34, %v4650_v36 }
0x1688   :  { %v4657_v37 = vpop.permute.xlu0 %4656 }
0x1689   :  { %v4659_v38 = vmul.f32 %v4657_v37, %v4650_v36 }
0x168b   :  { %4661 = vrot.lane.b32.xlu1 %v4659_v38, %s6623_s6 }
0x16fd   :  { %v4662_v41 = vpop.permute.xlu1 %4661 }
0x16fe   :  { %v4664_v47 = vadd.f32 %v4662_v41, %v4654_v40 }
0x1700   :  { %6541 = vtanh.f32 %v4664_v47 }
0x170a   :  { %v6542_v60 = vpop.eup %6541 }
0x170b   :  { %4667 = vrot.lane.b32.xlu0 %v6542_v60, %s6622_s1 }
0x177d   :  { %v4668_v2 = vpop.permute.xlu0 %4667 }
0x177e   :  { %v4670_v6 = vmul.f32 %v4668_v2, %v4650_v36 }
0x1780   :  { %v4672_v12 = vrot.slane %v4670_v6, 7 }
0x1782   :  { %4673 = vrot.lane.b32.xlu1 %v4672_v12, %s6623_s6 }
0x17f4   :  { %v4674_v22 = vpop.permute.xlu1 %4673 }
0x17f5   :  { %v4675_v23 = vsel %vm506_vm2, %v4674_v22, 0 }
0x17f6   :  { %v4746_v24 = vand.u32 4294901760, %v4675_v23 }
0x17f8   :  { %v4747_v25 = vsub.f32 %v4675_v23, %v4746_v24 }
0x17fa   :  { %v4748_v26 = vand.u32 4294901760, %v4747_v25 }
0x17fc   :  { %v4749_v27 = vsub.f32 %v4747_v25, %v4748_v26 }
0x17fe   :  { %v4750_v29 = vand.u32 4294901760, %v4749_v27 }
0x1800   :  { %6029 = vmatmul.mubr.f32.vlgmr.msra.gmra.mrb[12].mxu0 %v4750_v29 }
0x1801   :  { %6382 = vmatpush3.bf16.msra.mxu0 %v6381_v13  ;;  %6039 = vmatprep.mubr.msk.f32.mxu0 %vm6620_vm0, %v6619_v0 }
0x1802   :  { %6383 = vmatprep.subr.bf16.mxu0 %v6621_v16 }
0x1805   :  { %6385 = vmatpush3.bf16.msra.mxu0 %v6384_v17 }
0x1806   :  { %6386 = vmatprep.subr.bf16.mxu0 %v6621_v16 }
0x1808   :  { %6040 = vmatmul.mubr.f32.vlgmr.msra.gmra.mrb[12].mxu0 %v4746_v24 }
0x1809   :  { %6388 = vmatpush3.bf16.msra.mxu0 %v6387_v18  ;;  %6050 = vmatprep.mubr.msk.f32.mxu0 %vm6620_vm0, %v6619_v0 }
0x180a   :  { %6389 = vmatprep.subr.bf16.mxu0 %v6621_v16 }
0x180d   :  { %6391 = vmatpush3.bf16.msra.mxu0 %v6390_v19 }
0x180e   :  { %6392 = vmatprep.subr.bf16.mxu0 %v6621_v16 }
0x1810   :  { %6051 = vmatmul.mubr.f32.vlgmr.msra.gmra.mrb[12].mxu0 %v4747_v25 }
0x1811   :  { %6394 = vmatpush3.bf16.msra.mxu0 %v7111_v50  ;;  %6061 = vmatprep.mubr.msk.f32.mxu0 %vm6620_vm0, %v6619_v0 }
0x1812   :  { %6395 = vmatprep.subr.bf16.mxu0 %v6621_v16 }
0x1815   :  { %6397 = vmatpush3.bf16.msra.mxu0 %v6378_v59 }
0x1816   :  { %6398 = vmatprep.subr.bf16.mxu0 %v6621_v16 }
0x1818   :  { %6062 = vmatmul.mubr.f32.vlgmr.msra.gmra.mrb[12].mxu0 %v4748_v26 }
0x1819   :  { %6400 = vmatpush3.bf16.msra.mxu0 %v6399_v20  ;;  %6072 = vmatprep.mubr.msk.f32.mxu0 %vm6620_vm0, %v6619_v0 }
0x181a   :  { %6401 = vmatprep.subr.bf16.mxu0 %v6621_v16 }
0x181d   :  { %6403 = vmatpush3.bf16.msra.mxu0 %v6402_v21 }
0x181e   :  { %6404 = vmatprep.subr.bf16.mxu0 %v6621_v16 }
0x1820   :  { %6073 = vmatmul.mubr.f32.vlgmr.msra.gmra.mrb[12].mxu0 %v4746_v24 }
0x1821   :  { %6406 = vmatpush3.bf16.msra.mxu0 %v7111_v50  ;;  %6083 = vmatprep.mubr.msk.f32.mxu0 %vm6620_vm0, %v6619_v0 }
0x1822   :  { %6407 = vmatprep.subr.bf16.mxu0 %v6621_v16 }
0x1825   :  { %6409 = vmatpush3.bf16.msra.mxu0 %v6378_v59 }
0x1828   :  { %6084 = vmatmul.mubr.f32.vlgmr.msra.gmra.mrb[12].mxu0 %v4746_v24 }
0x18fb   :  { %v5158_v31 = vpop.f32.mrb[12].mxu0 }
0x18fc   :  { %v6412_v32 = vadd.f32 %v5158_v31, %v48_v30  ;;  %v6085_v33 = vpop.f32.mrb[13].mxu0 }
0x18fe   :  { %5162 = vst [vmem:[#allocation7] sm:$0x1] %v6412_v32 }
0x18ff   :  { %6598 = shalt.err (!%p6595_p6)
}
0x1900   :  { %s6599_s13 = scalar_lea.hbm %s7153_s2, 16 }
0x1901   :  { %p6600_p7 = scmp.ne.s32.totalorder %s7153_s2, %s6599_s13  ;;  %p6603_p8 = scmp.lt.u32.totalorder %s6599_s13, %s7153_s2 }
0x1903   :  { %p6605_p9 = pnand %p6603_p8, %p6600_p7 }
0x1905   :  { %6608 = shalt.err (!%p6605_p9)
}
0x1906   :  { %5172 = dma.vmem_to_hbm [thread:$0]  %s5170_s8, 16, %s7153_s2, [#allocation4]  }
0x1907   :  { %6613 = dma.done.wait [#allocation4], 16  }
0x1908   :  { %6614 = vsyncadd [#allocation4], 4294967280 }
0x1909   :  { %5176 = vsyncpa [#allocation3], 1 }
0x190a   :  { %5177 = vsyncpa [#allocation6], 1 }
0x190b   :  { %5178 = vsyncpa [#allocation4], 1 }

</bundles_post_ra>
